<compile_context>
chip_gen: v6e
topology: v6e:2x2x1
jax: 0.10.0
libtpu: 0.0.40
codegen_flags: <defaults>
</compile_context>

<pallas_src>
import math
import functools

import jax
import jax.numpy as jnp
from jax.experimental import pallas as pl
from jax.experimental.pallas import tpu as pltpu


# ----------------------------------------------------------------------------
# Synthetic encoder config (toy BERT; HF pretrained weights replaced by
# deterministic random init)
# ----------------------------------------------------------------------------
VOCAB = 64
MAX_POS = 16
HIDDEN = 32
N_HEADS = 4
HEAD_DIM = HIDDEN // N_HEADS
FF_DIM = 64
N_LAYERS = 2
N_CLASSES = 3


# ----------------------------------------------------------------------------
# Fused encoder + classifier kernel.  One grid step == one batch element.
# ----------------------------------------------------------------------------
def _xnli_encoder_kernel(h_ref, eg_ref, eb_ref,
                         wqkv_ref, bqkv_ref, wo_ref, bo_ref,
                         ln1g_ref, ln1b_ref,
                         wf1_ref, bf1_ref, wf2_ref, bf2_ref,
                         ln2g_ref, ln2b_ref,
                         wp_ref, bp_ref,
                         y_ref, *, n_layers, n_heads, head_dim, scale):
    H = n_heads * head_dim
    inv_sqrt2 = 1.0 / math.sqrt(2.0)

    def layernorm(x, g, b):
        mu = jnp.mean(x, axis=-1, keepdims=True)
        var = jnp.mean(jnp.square(x - mu), axis=-1, keepdims=True)
        return (x - mu) * jax.lax.rsqrt(var + 1e-12) * g + b

    # Embedding LayerNorm directly on the embedded tokens (no zero residual).
    h = layernorm(h_ref[0], eg_ref[...], eb_ref[...])          # (S, H)

    for l in range(n_layers):                                  # static unroll
        # ---- self-attention: fused QKV projection (one (H, 3H) matmul) ----
        qkv = (jnp.dot(h, wqkv_ref[l], preferred_element_type=jnp.float32)
               + bqkv_ref[l])                                  # (S, 3H)

        wo = wo_ref[l]                                         # (H, H)
        attn = jnp.zeros_like(h)                               # (S, H)
        for hd in range(n_heads):                              # static unroll
            o = hd * head_dim
            qh = qkv[:, o:o + head_dim]                        # (S, d)
            kh = qkv[:, H + o:H + o + head_dim]                # (S, d)
            vh = qkv[:, 2 * H + o:2 * H + o + head_dim]        # (S, d)
            # scores = q @ k^T  (dot_general avoids an explicit transpose)
            s = jax.lax.dot_general(
                qh, kh, (((1,), (1,)), ((), ())),
                preferred_element_type=jnp.float32) * scale    # (S, S)
            s = s - jnp.max(s, axis=-1, keepdims=True)
            p = jnp.exp(s)
            p = p / jnp.sum(p, axis=-1, keepdims=True)
            ctx_h = jnp.dot(p, vh, preferred_element_type=jnp.float32)  # (S, d)
            # Merge heads by accumulating per-head output-projection blocks:
            #   ctx @ Wo == sum_h ctx_h @ Wo[h*d:(h+1)*d, :]
            attn = attn + jnp.dot(ctx_h, wo[o:o + head_dim, :],
                                  preferred_element_type=jnp.float32)
        attn = attn + bo_ref[l]
        h = layernorm(h + attn, ln1g_ref[l], ln1b_ref[l])

        # ---- feed-forward (GELU = exact erf form, matching nn.GELU) ----
        ff = (jnp.dot(h, wf1_ref[l], preferred_element_type=jnp.float32)
              + bf1_ref[l])                                    # (S, F)
        ff = 0.5 * ff * (1.0 + jax.lax.erf(ff * inv_sqrt2))
        ff = (jnp.dot(ff, wf2_ref[l], preferred_element_type=jnp.float32)
              + bf2_ref[l])                                    # (S, H)
        h = layernorm(h + ff, ln2g_ref[l], ln2b_ref[l])

    # ---- fused classifier on the [CLS] token (row 0 of this batch) ----
    cls = h[0:1, :]                                            # (1, H)
    y_ref[0] = (jnp.dot(cls, wp_ref[...], preferred_element_type=jnp.float32)
                + bp_ref[...])                                 # (1, C)


# ----------------------------------------------------------------------------
# Wrapper: one pallas_call for the whole forward.
# ----------------------------------------------------------------------------
def xnli_forward(params, tokens):
    B, S = tokens.shape
    H, F, L, C = HIDDEN, FF_DIM, N_LAYERS, N_CLASSES

    # Embedding gather is glue, done in plain XLA.
    h = params["tok_emb"][tokens] + params["pos_emb"][:S][None, :, :]  # (B,S,H)

    kern = functools.partial(
        _xnli_encoder_kernel,
        n_layers=L, n_heads=N_HEADS, head_dim=HEAD_DIM,
        scale=1.0 / math.sqrt(HEAD_DIM))

    def full(shape):
        return pl.BlockSpec(shape, lambda b: (0,) * len(shape))

    y = pl.pallas_call(
        kern,
        # (B, 1, C) keeps the block's last two dims equal to the full array
        # dims; squeezed back to (B, C) below.
        out_shape=jax.ShapeDtypeStruct((B, 1, C), jnp.float32),
        grid=(B,),
        in_specs=[
            pl.BlockSpec((1, S, H), lambda b: (b, 0, 0)),   # embedded tokens
            full((1, H)), full((1, H)),                     # embedding LN
            full((L, H, 3 * H)), full((L, 1, 3 * H)),       # fused QKV
            full((L, H, H)), full((L, 1, H)),               # attn out proj
            full((L, 1, H)), full((L, 1, H)),               # LN1
            full((L, H, F)), full((L, 1, F)),               # FF1
            full((L, F, H)), full((L, 1, H)),               # FF2
            full((L, 1, H)), full((L, 1, H)),               # LN2
            full((H, C)), full((1, C)),                     # classifier
        ],
        out_specs=pl.BlockSpec((1, 1, C), lambda b: (b, 0, 0)),
        compiler_params=pltpu.CompilerParams(
            dimension_semantics=("parallel",)),             # batch across TCs on v7x
    )(h,
      params["emb_ln_g"], params["emb_ln_b"],
      params["wqkv"], params["bqkv"], params["wo"], params["bo"],
      params["ln1_g"], params["ln1_b"],
      params["wf1"], params["bf1"], params["wf2"], params["bf2"],
      params["ln2_g"], params["ln2_b"],
      params["wp"], params["bp"])
    return y[:, 0, :]                                        # (B, C)


# ----------------------------------------------------------------------------
# Deterministic parameter init (stacked per-layer weights)
# ----------------------------------------------------------------------------
def init_params(key):
    H, F, L, C = HIDDEN, FF_DIM, N_LAYERS, N_CLASSES
    ks = jax.random.split(key, 18)

    def nrm(k, shape, scale):
        return scale * jax.random.normal(k, shape, jnp.float32)

    return {
        "tok_emb": nrm(ks[0], (VOCAB, H), 0.02),
        "pos_emb": nrm(ks[1], (MAX_POS, H), 0.02),
        "emb_ln_g": 1.0 + nrm(ks[2], (1, H), 0.1),
        "emb_ln_b": nrm(ks[3], (1, H), 0.02),
        "wqkv": nrm(ks[4], (L, H, 3 * H), 1.0 / math.sqrt(H)),
        "bqkv": nrm(ks[5], (L, 1, 3 * H), 0.02),
        "wo": nrm(ks[6], (L, H, H), 1.0 / math.sqrt(H)),
        "bo": nrm(ks[7], (L, 1, H), 0.02),
        "ln1_g": 1.0 + nrm(ks[8], (L, 1, H), 0.1),
        "ln1_b": nrm(ks[9], (L, 1, H), 0.02),
        "wf1": nrm(ks[10], (L, H, F), 1.0 / math.sqrt(H)),
        "bf1": nrm(ks[11], (L, 1, F), 0.02),
        "wf2": nrm(ks[12], (L, F, H), 1.0 / math.sqrt(F)),
        "bf2": nrm(ks[13], (L, 1, H), 0.02),
        "ln2_g": 1.0 + nrm(ks[14], (L, 1, H), 0.1),
        "ln2_b": nrm(ks[15], (L, 1, H), 0.02),
        "wp": nrm(ks[16], (H, C), 1.0 / math.sqrt(H)),
        "bp": nrm(ks[17], (1, C), 0.02),
    }


# ----------------------------------------------------------------------------
# Pure-JAX reference (same math, standard layout) for correctness checking
# ----------------------------------------------------------------------------
def reference_forward(params, tokens):
    B, S = tokens.shape
    H, NH, D = HIDDEN, N_HEADS, HEAD_DIM

    def layernorm(x, g, b):
        mu = jnp.mean(x, axis=-1, keepdims=True)
        var = jnp.mean(jnp.square(x - mu), axis=-1, keepdims=True)
        return (x - mu) * jax.lax.rsqrt(var + 1e-12) * g + b

    h = params["tok_emb"][tokens] + params["pos_emb"][:S][None, :, :]
    h = layernorm(h, params["emb_ln_g"], params["emb_ln_b"])
    for l in range(N_LAYERS):
        qkv = h @ params["wqkv"][l] + params["bqkv"][l]
        q, k, v = qkv[..., :H], qkv[..., H:2 * H], qkv[..., 2 * H:]

        def heads(x):
            return x.reshape(B, S, NH, D).transpose(0, 2, 1, 3)

        qh, kh, vh = heads(q), heads(k), heads(v)
        s = jnp.einsum("bhqd,bhkd->bhqk", qh, kh) / math.sqrt(D)
        p = jax.nn.softmax(s, axis=-1)
        ctx = jnp.einsum("bhqk,bhkd->bhqd", p, vh)
        ctx = ctx.transpose(0, 2, 1, 3).reshape(B, S, H)
        attn = ctx @ params["wo"][l] + params["bo"][l]
        h = layernorm(h + attn, params["ln1_g"][l], params["ln1_b"][l])

        ff = h @ params["wf1"][l] + params["bf1"][l]
        ff = 0.5 * ff * (1.0 + jax.lax.erf(ff / math.sqrt(2.0)))
        ff = ff @ params["wf2"][l] + params["bf2"][l]
        h = layernorm(h + ff, params["ln2_g"][l], params["ln2_b"][l])
    return h[:, 0, :] @ params["wp"] + params["bp"]


# ----------------------------------------------------------------------------
if __name__ == "__main__":
    key = jax.random.PRNGKey(0)
    pkey, tkey = jax.random.split(key)

    params = init_params(pkey)

    B, S = 2, 8
    tokens = jax.random.randint(tkey, (B, S), 0, VOCAB, dtype=jnp.int32)

    y = jax.jit(xnli_forward)(params, tokens)
    jax.block_until_ready(y)
    assert y.shape == (B, N_CLASSES) and y.dtype == jnp.float32

    y_ref = reference_forward(params, tokens)
    assert jnp.allclose(y, y_ref, atol=1e-3, rtol=1e-3), (y, y_ref)

    print("KERNEL_OK")
</pallas_src>

<mosaic_0001>
module attributes {stable_mosaic.version = 11 : i64} {
  func.func @_xnli_encoder_kernel(%arg0: i32, %arg1: memref<1x8x32xf32, #tpu.memory_space<vmem>>, %arg2: memref<1x32xf32, #tpu.memory_space<vmem>>, %arg3: memref<1x32xf32, #tpu.memory_space<vmem>>, %arg4: memref<2x32x96xf32, #tpu.memory_space<vmem>>, %arg5: memref<2x1x96xf32, #tpu.memory_space<vmem>>, %arg6: memref<2x32x32xf32, #tpu.memory_space<vmem>>, %arg7: memref<2x1x32xf32, #tpu.memory_space<vmem>>, %arg8: memref<2x1x32xf32, #tpu.memory_space<vmem>>, %arg9: memref<2x1x32xf32, #tpu.memory_space<vmem>>, %arg10: memref<2x32x64xf32, #tpu.memory_space<vmem>>, %arg11: memref<2x1x64xf32, #tpu.memory_space<vmem>>, %arg12: memref<2x64x32xf32, #tpu.memory_space<vmem>>, %arg13: memref<2x1x32xf32, #tpu.memory_space<vmem>>, %arg14: memref<2x1x32xf32, #tpu.memory_space<vmem>>, %arg15: memref<2x1x32xf32, #tpu.memory_space<vmem>>, %arg16: memref<32x3xf32, #tpu.memory_space<vmem>>, %arg17: memref<1x3xf32, #tpu.memory_space<vmem>>, %arg18: memref<1x1x3xf32, #tpu.memory_space<vmem>>) attributes {dimension_semantics = [#tpu.dimension_semantics<parallel>], iteration_bounds = array<i64: 2>, scalar_prefetch = 0 : i64, scratch_operands = 0 : i64, tpu.core_type = #tpu.core_type<tc>, window_params = [{transform_indices = @transform_0, window_bounds = array<i64: 1, 8, 32>}, {pipeline_mode = #tpu.pipeline_mode<synchronous>, transform_indices = @transform_1, window_bounds = array<i64: 1, 32>}, {pipeline_mode = #tpu.pipeline_mode<synchronous>, transform_indices = @transform_2, window_bounds = array<i64: 1, 32>}, {pipeline_mode = #tpu.pipeline_mode<synchronous>, transform_indices = @transform_3, window_bounds = array<i64: 2, 32, 96>}, {pipeline_mode = #tpu.pipeline_mode<synchronous>, transform_indices = @transform_4, window_bounds = array<i64: 2, 1, 96>}, {pipeline_mode = #tpu.pipeline_mode<synchronous>, transform_indices = @transform_5, window_bounds = array<i64: 2, 32, 32>}, {pipeline_mode = #tpu.pipeline_mode<synchronous>, transform_indices = @transform_6, window_bounds = array<i64: 2, 1, 32>}, {pipeline_mode = #tpu.pipeline_mode<synchronous>, transform_indices = @transform_7, window_bounds = array<i64: 2, 1, 32>}, {pipeline_mode = #tpu.pipeline_mode<synchronous>, transform_indices = @transform_8, window_bounds = array<i64: 2, 1, 32>}, {pipeline_mode = #tpu.pipeline_mode<synchronous>, transform_indices = @transform_9, window_bounds = array<i64: 2, 32, 64>}, {pipeline_mode = #tpu.pipeline_mode<synchronous>, transform_indices = @transform_10, window_bounds = array<i64: 2, 1, 64>}, {pipeline_mode = #tpu.pipeline_mode<synchronous>, transform_indices = @transform_11, window_bounds = array<i64: 2, 64, 32>}, {pipeline_mode = #tpu.pipeline_mode<synchronous>, transform_indices = @transform_12, window_bounds = array<i64: 2, 1, 32>}, {pipeline_mode = #tpu.pipeline_mode<synchronous>, transform_indices = @transform_13, window_bounds = array<i64: 2, 1, 32>}, {pipeline_mode = #tpu.pipeline_mode<synchronous>, transform_indices = @transform_14, window_bounds = array<i64: 2, 1, 32>}, {pipeline_mode = #tpu.pipeline_mode<synchronous>, transform_indices = @transform_15, window_bounds = array<i64: 32, 3>}, {pipeline_mode = #tpu.pipeline_mode<synchronous>, transform_indices = @transform_16, window_bounds = array<i64: 1, 3>}, {transform_indices = @transform_17, window_bounds = array<i64: 1, 1, 3>}]} {
    %c0 = arith.constant 0 : index
    %c0_0 = arith.constant 0 : index
    %c0_1 = arith.constant 0 : index
    %0 = vector.load %arg1[%c0, %c0_0, %c0_1] : memref<1x8x32xf32, #tpu.memory_space<vmem>>, vector<1x8x32xf32>
    %1 = vector.shape_cast %0 : vector<1x8x32xf32> to vector<8x32xf32>
    %c0_2 = arith.constant 0 : index
    %c0_3 = arith.constant 0 : index
    %2 = vector.load %arg2[%c0_2, %c0_3] : memref<1x32xf32, #tpu.memory_space<vmem>>, vector<1x32xf32>
    %c0_4 = arith.constant 0 : index
    %c0_5 = arith.constant 0 : index
    %3 = vector.load %arg3[%c0_4, %c0_5] : memref<1x32xf32, #tpu.memory_space<vmem>>, vector<1x32xf32>
    %cst = arith.constant dense<0.000000e+00> : vector<8xf32>
    %4 = vector.multi_reduction <add>, %1, %cst [1] : vector<8x32xf32> to vector<8xf32>
    %5 = vector.shape_cast %4 : vector<8xf32> to vector<8x1xf32>
    %cst_6 = arith.constant 3.200000e+01 : f32
    %6 = vector.broadcast %cst_6 : f32 to vector<8x1xf32>
    %7 = arith.divf %5, %6 : vector<8x1xf32>
    %8 = vector.broadcast %7 : vector<8x1xf32> to vector<8x32xf32>
    %9 = arith.subf %1, %8 : vector<8x32xf32>
    %10 = arith.mulf %9, %9 : vector<8x32xf32>
    %cst_7 = arith.constant dense<0.000000e+00> : vector<8xf32>
    %11 = vector.multi_reduction <add>, %10, %cst_7 [1] : vector<8x32xf32> to vector<8xf32>
    %12 = vector.shape_cast %11 : vector<8xf32> to vector<8x1xf32>
    %cst_8 = arith.constant 3.200000e+01 : f32
    %13 = vector.broadcast %cst_8 : f32 to vector<8x1xf32>
    %14 = arith.divf %12, %13 : vector<8x1xf32>
    %15 = vector.broadcast %7 : vector<8x1xf32> to vector<8x32xf32>
    %16 = arith.subf %1, %15 : vector<8x32xf32>
    %cst_9 = arith.constant 9.99999996E-13 : f32
    %17 = vector.broadcast %cst_9 : f32 to vector<8x1xf32>
    %18 = arith.addf %14, %17 : vector<8x1xf32>
    %19 = math.rsqrt %18 : vector<8x1xf32>
    %20 = vector.broadcast %19 : vector<8x1xf32> to vector<8x32xf32>
    %21 = arith.mulf %16, %20 : vector<8x32xf32>
    %22 = vector.broadcast %2 : vector<1x32xf32> to vector<8x32xf32>
    %23 = arith.mulf %21, %22 : vector<8x32xf32>
    %24 = vector.broadcast %3 : vector<1x32xf32> to vector<8x32xf32>
    %25 = arith.addf %23, %24 : vector<8x32xf32>
    %c0_10 = arith.constant 0 : index
    %c0_11 = arith.constant 0 : index
    %c0_12 = arith.constant 0 : index
    %26 = vector.load %arg4[%c0_10, %c0_11, %c0_12] : memref<2x32x96xf32, #tpu.memory_space<vmem>>, vector<1x32x96xf32>
    %27 = vector.shape_cast %26 : vector<1x32x96xf32> to vector<32x96xf32>
    %cst_13 = arith.constant dense<0.000000e+00> : vector<8x96xf32>
    %28 = tpu.matmul %25, %27, %cst_13 {dimension_numbers = #tpu.dot_dimension_numbers<[1], [0], [0], [1], [0, 0, 1, 1], [], []>} : vector<8x32xf32>, vector<32x96xf32>, vector<8x96xf32> -> vector<8x96xf32>
    %c0_14 = arith.constant 0 : index
    %c0_15 = arith.constant 0 : index
    %c0_16 = arith.constant 0 : index
    %29 = vector.load %arg5[%c0_14, %c0_15, %c0_16] : memref<2x1x96xf32, #tpu.memory_space<vmem>>, vector<1x1x96xf32>
    %30 = vector.shape_cast %29 : vector<1x1x96xf32> to vector<1x96xf32>
    %31 = vector.broadcast %30 : vector<1x96xf32> to vector<8x96xf32>
    %32 = arith.addf %28, %31 : vector<8x96xf32>
    %c0_17 = arith.constant 0 : index
    %c0_18 = arith.constant 0 : index
    %c0_19 = arith.constant 0 : index
    %33 = vector.load %arg6[%c0_17, %c0_18, %c0_19] : memref<2x32x32xf32, #tpu.memory_space<vmem>>, vector<1x32x32xf32>
    %34 = vector.shape_cast %33 : vector<1x32x32xf32> to vector<32x32xf32>
    %cst_20 = arith.constant 0.000000e+00 : f32
    %35 = vector.broadcast %cst_20 : f32 to vector<8x32xf32>
    %36 = vector.extract_strided_slice %32 {offsets = [0, 0], sizes = [8, 8], strides = [1, 1]} : vector<8x96xf32> to vector<8x8xf32>
    %37 = vector.extract_strided_slice %32 {offsets = [0, 32], sizes = [8, 8], strides = [1, 1]} : vector<8x96xf32> to vector<8x8xf32>
    %38 = vector.extract_strided_slice %32 {offsets = [0, 64], sizes = [8, 8], strides = [1, 1]} : vector<8x96xf32> to vector<8x8xf32>
    %cst_21 = arith.constant dense<0.000000e+00> : vector<8x8xf32>
    %39 = tpu.matmul %36, %37, %cst_21 {dimension_numbers = #tpu.dot_dimension_numbers<[1], [1], [0], [0], [0, 0, 1, 0], [], []>} : vector<8x8xf32>, vector<8x8xf32>, vector<8x8xf32> -> vector<8x8xf32>
    %cst_22 = arith.constant 0.353553385 : f32
    %40 = vector.broadcast %cst_22 : f32 to vector<8x8xf32>
    %41 = arith.mulf %39, %40 : vector<8x8xf32>
    %cst_23 = arith.constant dense<0xFF800000> : vector<8xf32>
    %42 = vector.multi_reduction <maximumf>, %41, %cst_23 [1] : vector<8x8xf32> to vector<8xf32>
    %43 = vector.shape_cast %42 : vector<8xf32> to vector<8x1xf32>
    %44 = vector.broadcast %43 : vector<8x1xf32> to vector<8x8xf32>
    %45 = arith.subf %41, %44 : vector<8x8xf32>
    %46 = math.exp %45 : vector<8x8xf32>
    %cst_24 = arith.constant dense<0.000000e+00> : vector<8xf32>
    %47 = vector.multi_reduction <add>, %46, %cst_24 [1] : vector<8x8xf32> to vector<8xf32>
    %48 = vector.shape_cast %47 : vector<8xf32> to vector<8x1xf32>
    %49 = vector.broadcast %48 : vector<8x1xf32> to vector<8x8xf32>
    %50 = arith.divf %46, %49 : vector<8x8xf32>
    %cst_25 = arith.constant dense<0.000000e+00> : vector<8x8xf32>
    %51 = tpu.matmul %50, %38, %cst_25 {dimension_numbers = #tpu.dot_dimension_numbers<[1], [0], [0], [1], [0, 0, 1, 1], [], []>} : vector<8x8xf32>, vector<8x8xf32>, vector<8x8xf32> -> vector<8x8xf32>
    %52 = vector.extract_strided_slice %34 {offsets = [0, 0], sizes = [8, 32], strides = [1, 1]} : vector<32x32xf32> to vector<8x32xf32>
    %cst_26 = arith.constant dense<0.000000e+00> : vector<8x32xf32>
    %53 = tpu.matmul %51, %52, %cst_26 {dimension_numbers = #tpu.dot_dimension_numbers<[1], [0], [0], [1], [0, 0, 1, 1], [], []>} : vector<8x8xf32>, vector<8x32xf32>, vector<8x32xf32> -> vector<8x32xf32>
    %54 = arith.addf %35, %53 : vector<8x32xf32>
    %55 = vector.extract_strided_slice %32 {offsets = [0, 8], sizes = [8, 8], strides = [1, 1]} : vector<8x96xf32> to vector<8x8xf32>
    %56 = vector.extract_strided_slice %32 {offsets = [0, 40], sizes = [8, 8], strides = [1, 1]} : vector<8x96xf32> to vector<8x8xf32>
    %57 = vector.extract_strided_slice %32 {offsets = [0, 72], sizes = [8, 8], strides = [1, 1]} : vector<8x96xf32> to vector<8x8xf32>
    %cst_27 = arith.constant dense<0.000000e+00> : vector<8x8xf32>
    %58 = tpu.matmul %55, %56, %cst_27 {dimension_numbers = #tpu.dot_dimension_numbers<[1], [1], [0], [0], [0, 0, 1, 0], [], []>} : vector<8x8xf32>, vector<8x8xf32>, vector<8x8xf32> -> vector<8x8xf32>
    %cst_28 = arith.constant 0.353553385 : f32
    %59 = vector.broadcast %cst_28 : f32 to vector<8x8xf32>
    %60 = arith.mulf %58, %59 : vector<8x8xf32>
    %cst_29 = arith.constant dense<0xFF800000> : vector<8xf32>
    %61 = vector.multi_reduction <maximumf>, %60, %cst_29 [1] : vector<8x8xf32> to vector<8xf32>
    %62 = vector.shape_cast %61 : vector<8xf32> to vector<8x1xf32>
    %63 = vector.broadcast %62 : vector<8x1xf32> to vector<8x8xf32>
    %64 = arith.subf %60, %63 : vector<8x8xf32>
    %65 = math.exp %64 : vector<8x8xf32>
    %cst_30 = arith.constant dense<0.000000e+00> : vector<8xf32>
    %66 = vector.multi_reduction <add>, %65, %cst_30 [1] : vector<8x8xf32> to vector<8xf32>
    %67 = vector.shape_cast %66 : vector<8xf32> to vector<8x1xf32>
    %68 = vector.broadcast %67 : vector<8x1xf32> to vector<8x8xf32>
    %69 = arith.divf %65, %68 : vector<8x8xf32>
    %cst_31 = arith.constant dense<0.000000e+00> : vector<8x8xf32>
    %70 = tpu.matmul %69, %57, %cst_31 {dimension_numbers = #tpu.dot_dimension_numbers<[1], [0], [0], [1], [0, 0, 1, 1], [], []>} : vector<8x8xf32>, vector<8x8xf32>, vector<8x8xf32> -> vector<8x8xf32>
    %71 = vector.extract_strided_slice %34 {offsets = [8, 0], sizes = [8, 32], strides = [1, 1]} : vector<32x32xf32> to vector<8x32xf32>
    %cst_32 = arith.constant dense<0.000000e+00> : vector<8x32xf32>
    %72 = tpu.matmul %70, %71, %cst_32 {dimension_numbers = #tpu.dot_dimension_numbers<[1], [0], [0], [1], [0, 0, 1, 1], [], []>} : vector<8x8xf32>, vector<8x32xf32>, vector<8x32xf32> -> vector<8x32xf32>
    %73 = arith.addf %54, %72 : vector<8x32xf32>
    %74 = vector.extract_strided_slice %32 {offsets = [0, 16], sizes = [8, 8], strides = [1, 1]} : vector<8x96xf32> to vector<8x8xf32>
    %75 = vector.extract_strided_slice %32 {offsets = [0, 48], sizes = [8, 8], strides = [1, 1]} : vector<8x96xf32> to vector<8x8xf32>
    %76 = vector.extract_strided_slice %32 {offsets = [0, 80], sizes = [8, 8], strides = [1, 1]} : vector<8x96xf32> to vector<8x8xf32>
    %cst_33 = arith.constant dense<0.000000e+00> : vector<8x8xf32>
    %77 = tpu.matmul %74, %75, %cst_33 {dimension_numbers = #tpu.dot_dimension_numbers<[1], [1], [0], [0], [0, 0, 1, 0], [], []>} : vector<8x8xf32>, vector<8x8xf32>, vector<8x8xf32> -> vector<8x8xf32>
    %cst_34 = arith.constant 0.353553385 : f32
    %78 = vector.broadcast %cst_34 : f32 to vector<8x8xf32>
    %79 = arith.mulf %77, %78 : vector<8x8xf32>
    %cst_35 = arith.constant dense<0xFF800000> : vector<8xf32>
    %80 = vector.multi_reduction <maximumf>, %79, %cst_35 [1] : vector<8x8xf32> to vector<8xf32>
    %81 = vector.shape_cast %80 : vector<8xf32> to vector<8x1xf32>
    %82 = vector.broadcast %81 : vector<8x1xf32> to vector<8x8xf32>
    %83 = arith.subf %79, %82 : vector<8x8xf32>
    %84 = math.exp %83 : vector<8x8xf32>
    %cst_36 = arith.constant dense<0.000000e+00> : vector<8xf32>
    %85 = vector.multi_reduction <add>, %84, %cst_36 [1] : vector<8x8xf32> to vector<8xf32>
    %86 = vector.shape_cast %85 : vector<8xf32> to vector<8x1xf32>
    %87 = vector.broadcast %86 : vector<8x1xf32> to vector<8x8xf32>
    %88 = arith.divf %84, %87 : vector<8x8xf32>
    %cst_37 = arith.constant dense<0.000000e+00> : vector<8x8xf32>
    %89 = tpu.matmul %88, %76, %cst_37 {dimension_numbers = #tpu.dot_dimension_numbers<[1], [0], [0], [1], [0, 0, 1, 1], [], []>} : vector<8x8xf32>, vector<8x8xf32>, vector<8x8xf32> -> vector<8x8xf32>
    %90 = vector.extract_strided_slice %34 {offsets = [16, 0], sizes = [8, 32], strides = [1, 1]} : vector<32x32xf32> to vector<8x32xf32>
    %cst_38 = arith.constant dense<0.000000e+00> : vector<8x32xf32>
    %91 = tpu.matmul %89, %90, %cst_38 {dimension_numbers = #tpu.dot_dimension_numbers<[1], [0], [0], [1], [0, 0, 1, 1], [], []>} : vector<8x8xf32>, vector<8x32xf32>, vector<8x32xf32> -> vector<8x32xf32>
    %92 = arith.addf %73, %91 : vector<8x32xf32>
    %93 = vector.extract_strided_slice %32 {offsets = [0, 24], sizes = [8, 8], strides = [1, 1]} : vector<8x96xf32> to vector<8x8xf32>
    %94 = vector.extract_strided_slice %32 {offsets = [0, 56], sizes = [8, 8], strides = [1, 1]} : vector<8x96xf32> to vector<8x8xf32>
    %95 = vector.extract_strided_slice %32 {offsets = [0, 88], sizes = [8, 8], strides = [1, 1]} : vector<8x96xf32> to vector<8x8xf32>
    %cst_39 = arith.constant dense<0.000000e+00> : vector<8x8xf32>
    %96 = tpu.matmul %93, %94, %cst_39 {dimension_numbers = #tpu.dot_dimension_numbers<[1], [1], [0], [0], [0, 0, 1, 0], [], []>} : vector<8x8xf32>, vector<8x8xf32>, vector<8x8xf32> -> vector<8x8xf32>
    %cst_40 = arith.constant 0.353553385 : f32
    %97 = vector.broadcast %cst_40 : f32 to vector<8x8xf32>
    %98 = arith.mulf %96, %97 : vector<8x8xf32>
    %cst_41 = arith.constant dense<0xFF800000> : vector<8xf32>
    %99 = vector.multi_reduction <maximumf>, %98, %cst_41 [1] : vector<8x8xf32> to vector<8xf32>
    %100 = vector.shape_cast %99 : vector<8xf32> to vector<8x1xf32>
    %101 = vector.broadcast %100 : vector<8x1xf32> to vector<8x8xf32>
    %102 = arith.subf %98, %101 : vector<8x8xf32>
    %103 = math.exp %102 : vector<8x8xf32>
    %cst_42 = arith.constant dense<0.000000e+00> : vector<8xf32>
    %104 = vector.multi_reduction <add>, %103, %cst_42 [1] : vector<8x8xf32> to vector<8xf32>
    %105 = vector.shape_cast %104 : vector<8xf32> to vector<8x1xf32>
    %106 = vector.broadcast %105 : vector<8x1xf32> to vector<8x8xf32>
    %107 = arith.divf %103, %106 : vector<8x8xf32>
    %cst_43 = arith.constant dense<0.000000e+00> : vector<8x8xf32>
    %108 = tpu.matmul %107, %95, %cst_43 {dimension_numbers = #tpu.dot_dimension_numbers<[1], [0], [0], [1], [0, 0, 1, 1], [], []>} : vector<8x8xf32>, vector<8x8xf32>, vector<8x8xf32> -> vector<8x8xf32>
    %109 = vector.extract_strided_slice %34 {offsets = [24, 0], sizes = [8, 32], strides = [1, 1]} : vector<32x32xf32> to vector<8x32xf32>
    %cst_44 = arith.constant dense<0.000000e+00> : vector<8x32xf32>
    %110 = tpu.matmul %108, %109, %cst_44 {dimension_numbers = #tpu.dot_dimension_numbers<[1], [0], [0], [1], [0, 0, 1, 1], [], []>} : vector<8x8xf32>, vector<8x32xf32>, vector<8x32xf32> -> vector<8x32xf32>
    %111 = arith.addf %92, %110 : vector<8x32xf32>
    %c0_45 = arith.constant 0 : index
    %c0_46 = arith.constant 0 : index
    %c0_47 = arith.constant 0 : index
    %112 = vector.load %arg7[%c0_45, %c0_46, %c0_47] : memref<2x1x32xf32, #tpu.memory_space<vmem>>, vector<1x1x32xf32>
    %113 = vector.shape_cast %112 : vector<1x1x32xf32> to vector<1x32xf32>
    %114 = vector.broadcast %113 : vector<1x32xf32> to vector<8x32xf32>
    %115 = arith.addf %111, %114 : vector<8x32xf32>
    %116 = arith.addf %25, %115 : vector<8x32xf32>
    %c0_48 = arith.constant 0 : index
    %c0_49 = arith.constant 0 : index
    %c0_50 = arith.constant 0 : index
    %117 = vector.load %arg8[%c0_48, %c0_49, %c0_50] : memref<2x1x32xf32, #tpu.memory_space<vmem>>, vector<1x1x32xf32>
    %118 = vector.shape_cast %117 : vector<1x1x32xf32> to vector<1x32xf32>
    %c0_51 = arith.constant 0 : index
    %c0_52 = arith.constant 0 : index
    %c0_53 = arith.constant 0 : index
    %119 = vector.load %arg9[%c0_51, %c0_52, %c0_53] : memref<2x1x32xf32, #tpu.memory_space<vmem>>, vector<1x1x32xf32>
    %120 = vector.shape_cast %119 : vector<1x1x32xf32> to vector<1x32xf32>
    %cst_54 = arith.constant dense<0.000000e+00> : vector<8xf32>
    %121 = vector.multi_reduction <add>, %116, %cst_54 [1] : vector<8x32xf32> to vector<8xf32>
    %122 = vector.shape_cast %121 : vector<8xf32> to vector<8x1xf32>
    %cst_55 = arith.constant 3.200000e+01 : f32
    %123 = vector.broadcast %cst_55 : f32 to vector<8x1xf32>
    %124 = arith.divf %122, %123 : vector<8x1xf32>
    %125 = vector.broadcast %124 : vector<8x1xf32> to vector<8x32xf32>
    %126 = arith.subf %116, %125 : vector<8x32xf32>
    %127 = arith.mulf %126, %126 : vector<8x32xf32>
    %cst_56 = arith.constant dense<0.000000e+00> : vector<8xf32>
    %128 = vector.multi_reduction <add>, %127, %cst_56 [1] : vector<8x32xf32> to vector<8xf32>
    %129 = vector.shape_cast %128 : vector<8xf32> to vector<8x1xf32>
    %cst_57 = arith.constant 3.200000e+01 : f32
    %130 = vector.broadcast %cst_57 : f32 to vector<8x1xf32>
    %131 = arith.divf %129, %130 : vector<8x1xf32>
    %132 = vector.broadcast %124 : vector<8x1xf32> to vector<8x32xf32>
    %133 = arith.subf %116, %132 : vector<8x32xf32>
    %cst_58 = arith.constant 9.99999996E-13 : f32
    %134 = vector.broadcast %cst_58 : f32 to vector<8x1xf32>
    %135 = arith.addf %131, %134 : vector<8x1xf32>
    %136 = math.rsqrt %135 : vector<8x1xf32>
    %137 = vector.broadcast %136 : vector<8x1xf32> to vector<8x32xf32>
    %138 = arith.mulf %133, %137 : vector<8x32xf32>
    %139 = vector.broadcast %118 : vector<1x32xf32> to vector<8x32xf32>
    %140 = arith.mulf %138, %139 : vector<8x32xf32>
    %141 = vector.broadcast %120 : vector<1x32xf32> to vector<8x32xf32>
    %142 = arith.addf %140, %141 : vector<8x32xf32>
    %c0_59 = arith.constant 0 : index
    %c0_60 = arith.constant 0 : index
    %c0_61 = arith.constant 0 : index
    %143 = vector.load %arg10[%c0_59, %c0_60, %c0_61] : memref<2x32x64xf32, #tpu.memory_space<vmem>>, vector<1x32x64xf32>
    %144 = vector.shape_cast %143 : vector<1x32x64xf32> to vector<32x64xf32>
    %cst_62 = arith.constant dense<0.000000e+00> : vector<8x64xf32>
    %145 = tpu.matmul %142, %144, %cst_62 {dimension_numbers = #tpu.dot_dimension_numbers<[1], [0], [0], [1], [0, 0, 1, 1], [], []>} : vector<8x32xf32>, vector<32x64xf32>, vector<8x64xf32> -> vector<8x64xf32>
    %c0_63 = arith.constant 0 : index
    %c0_64 = arith.constant 0 : index
    %c0_65 = arith.constant 0 : index
    %146 = vector.load %arg11[%c0_63, %c0_64, %c0_65] : memref<2x1x64xf32, #tpu.memory_space<vmem>>, vector<1x1x64xf32>
    %147 = vector.shape_cast %146 : vector<1x1x64xf32> to vector<1x64xf32>
    %148 = vector.broadcast %147 : vector<1x64xf32> to vector<8x64xf32>
    %149 = arith.addf %145, %148 : vector<8x64xf32>
    %cst_66 = arith.constant 5.000000e-01 : f32
    %150 = vector.broadcast %cst_66 : f32 to vector<8x64xf32>
    %151 = arith.mulf %150, %149 : vector<8x64xf32>
    %cst_67 = arith.constant 0.707106769 : f32
    %152 = vector.broadcast %cst_67 : f32 to vector<8x64xf32>
    %153 = arith.mulf %149, %152 : vector<8x64xf32>
    %154 = math.erf %153 : vector<8x64xf32>
    %cst_68 = arith.constant 1.000000e+00 : f32
    %155 = vector.broadcast %cst_68 : f32 to vector<8x64xf32>
    %156 = arith.addf %155, %154 : vector<8x64xf32>
    %157 = arith.mulf %151, %156 : vector<8x64xf32>
    %c0_69 = arith.constant 0 : index
    %c0_70 = arith.constant 0 : index
    %c0_71 = arith.constant 0 : index
    %158 = vector.load %arg12[%c0_69, %c0_70, %c0_71] : memref<2x64x32xf32, #tpu.memory_space<vmem>>, vector<1x64x32xf32>
    %159 = vector.shape_cast %158 : vector<1x64x32xf32> to vector<64x32xf32>
    %cst_72 = arith.constant dense<0.000000e+00> : vector<8x32xf32>
    %160 = tpu.matmul %157, %159, %cst_72 {dimension_numbers = #tpu.dot_dimension_numbers<[1], [0], [0], [1], [0, 0, 1, 1], [], []>} : vector<8x64xf32>, vector<64x32xf32>, vector<8x32xf32> -> vector<8x32xf32>
    %c0_73 = arith.constant 0 : index
    %c0_74 = arith.constant 0 : index
    %c0_75 = arith.constant 0 : index
    %161 = vector.load %arg13[%c0_73, %c0_74, %c0_75] : memref<2x1x32xf32, #tpu.memory_space<vmem>>, vector<1x1x32xf32>
    %162 = vector.shape_cast %161 : vector<1x1x32xf32> to vector<1x32xf32>
    %163 = vector.broadcast %162 : vector<1x32xf32> to vector<8x32xf32>
    %164 = arith.addf %160, %163 : vector<8x32xf32>
    %165 = arith.addf %142, %164 : vector<8x32xf32>
    %c0_76 = arith.constant 0 : index
    %c0_77 = arith.constant 0 : index
    %c0_78 = arith.constant 0 : index
    %166 = vector.load %arg14[%c0_76, %c0_77, %c0_78] : memref<2x1x32xf32, #tpu.memory_space<vmem>>, vector<1x1x32xf32>
    %167 = vector.shape_cast %166 : vector<1x1x32xf32> to vector<1x32xf32>
    %c0_79 = arith.constant 0 : index
    %c0_80 = arith.constant 0 : index
    %c0_81 = arith.constant 0 : index
    %168 = vector.load %arg15[%c0_79, %c0_80, %c0_81] : memref<2x1x32xf32, #tpu.memory_space<vmem>>, vector<1x1x32xf32>
    %169 = vector.shape_cast %168 : vector<1x1x32xf32> to vector<1x32xf32>
    %cst_82 = arith.constant dense<0.000000e+00> : vector<8xf32>
    %170 = vector.multi_reduction <add>, %165, %cst_82 [1] : vector<8x32xf32> to vector<8xf32>
    %171 = vector.shape_cast %170 : vector<8xf32> to vector<8x1xf32>
    %cst_83 = arith.constant 3.200000e+01 : f32
    %172 = vector.broadcast %cst_83 : f32 to vector<8x1xf32>
    %173 = arith.divf %171, %172 : vector<8x1xf32>
    %174 = vector.broadcast %173 : vector<8x1xf32> to vector<8x32xf32>
    %175 = arith.subf %165, %174 : vector<8x32xf32>
    %176 = arith.mulf %175, %175 : vector<8x32xf32>
    %cst_84 = arith.constant dense<0.000000e+00> : vector<8xf32>
    %177 = vector.multi_reduction <add>, %176, %cst_84 [1] : vector<8x32xf32> to vector<8xf32>
    %178 = vector.shape_cast %177 : vector<8xf32> to vector<8x1xf32>
    %cst_85 = arith.constant 3.200000e+01 : f32
    %179 = vector.broadcast %cst_85 : f32 to vector<8x1xf32>
    %180 = arith.divf %178, %179 : vector<8x1xf32>
    %181 = vector.broadcast %173 : vector<8x1xf32> to vector<8x32xf32>
    %182 = arith.subf %165, %181 : vector<8x32xf32>
    %cst_86 = arith.constant 9.99999996E-13 : f32
    %183 = vector.broadcast %cst_86 : f32 to vector<8x1xf32>
    %184 = arith.addf %180, %183 : vector<8x1xf32>
    %185 = math.rsqrt %184 : vector<8x1xf32>
    %186 = vector.broadcast %185 : vector<8x1xf32> to vector<8x32xf32>
    %187 = arith.mulf %182, %186 : vector<8x32xf32>
    %188 = vector.broadcast %167 : vector<1x32xf32> to vector<8x32xf32>
    %189 = arith.mulf %187, %188 : vector<8x32xf32>
    %190 = vector.broadcast %169 : vector<1x32xf32> to vector<8x32xf32>
    %191 = arith.addf %189, %190 : vector<8x32xf32>
    %c1 = arith.constant 1 : index
    %c0_87 = arith.constant 0 : index
    %c0_88 = arith.constant 0 : index
    %192 = vector.load %arg4[%c1, %c0_87, %c0_88] : memref<2x32x96xf32, #tpu.memory_space<vmem>>, vector<1x32x96xf32>
    %193 = vector.shape_cast %192 : vector<1x32x96xf32> to vector<32x96xf32>
    %cst_89 = arith.constant dense<0.000000e+00> : vector<8x96xf32>
    %194 = tpu.matmul %191, %193, %cst_89 {dimension_numbers = #tpu.dot_dimension_numbers<[1], [0], [0], [1], [0, 0, 1, 1], [], []>} : vector<8x32xf32>, vector<32x96xf32>, vector<8x96xf32> -> vector<8x96xf32>
    %c1_90 = arith.constant 1 : index
    %c0_91 = arith.constant 0 : index
    %c0_92 = arith.constant 0 : index
    %195 = vector.load %arg5[%c1_90, %c0_91, %c0_92] : memref<2x1x96xf32, #tpu.memory_space<vmem>>, vector<1x1x96xf32>
    %196 = vector.shape_cast %195 : vector<1x1x96xf32> to vector<1x96xf32>
    %197 = vector.broadcast %196 : vector<1x96xf32> to vector<8x96xf32>
    %198 = arith.addf %194, %197 : vector<8x96xf32>
    %c1_93 = arith.constant 1 : index
    %c0_94 = arith.constant 0 : index
    %c0_95 = arith.constant 0 : index
    %199 = vector.load %arg6[%c1_93, %c0_94, %c0_95] : memref<2x32x32xf32, #tpu.memory_space<vmem>>, vector<1x32x32xf32>
    %200 = vector.shape_cast %199 : vector<1x32x32xf32> to vector<32x32xf32>
    %cst_96 = arith.constant 0.000000e+00 : f32
    %201 = vector.broadcast %cst_96 : f32 to vector<8x32xf32>
    %202 = vector.extract_strided_slice %198 {offsets = [0, 0], sizes = [8, 8], strides = [1, 1]} : vector<8x96xf32> to vector<8x8xf32>
    %203 = vector.extract_strided_slice %198 {offsets = [0, 32], sizes = [8, 8], strides = [1, 1]} : vector<8x96xf32> to vector<8x8xf32>
    %204 = vector.extract_strided_slice %198 {offsets = [0, 64], sizes = [8, 8], strides = [1, 1]} : vector<8x96xf32> to vector<8x8xf32>
    %cst_97 = arith.constant dense<0.000000e+00> : vector<8x8xf32>
    %205 = tpu.matmul %202, %203, %cst_97 {dimension_numbers = #tpu.dot_dimension_numbers<[1], [1], [0], [0], [0, 0, 1, 0], [], []>} : vector<8x8xf32>, vector<8x8xf32>, vector<8x8xf32> -> vector<8x8xf32>
    %cst_98 = arith.constant 0.353553385 : f32
    %206 = vector.broadcast %cst_98 : f32 to vector<8x8xf32>
    %207 = arith.mulf %205, %206 : vector<8x8xf32>
    %cst_99 = arith.constant dense<0xFF800000> : vector<8xf32>
    %208 = vector.multi_reduction <maximumf>, %207, %cst_99 [1] : vector<8x8xf32> to vector<8xf32>
    %209 = vector.shape_cast %208 : vector<8xf32> to vector<8x1xf32>
    %210 = vector.broadcast %209 : vector<8x1xf32> to vector<8x8xf32>
    %211 = arith.subf %207, %210 : vector<8x8xf32>
    %212 = math.exp %211 : vector<8x8xf32>
    %cst_100 = arith.constant dense<0.000000e+00> : vector<8xf32>
    %213 = vector.multi_reduction <add>, %212, %cst_100 [1] : vector<8x8xf32> to vector<8xf32>
    %214 = vector.shape_cast %213 : vector<8xf32> to vector<8x1xf32>
    %215 = vector.broadcast %214 : vector<8x1xf32> to vector<8x8xf32>
    %216 = arith.divf %212, %215 : vector<8x8xf32>
    %cst_101 = arith.constant dense<0.000000e+00> : vector<8x8xf32>
    %217 = tpu.matmul %216, %204, %cst_101 {dimension_numbers = #tpu.dot_dimension_numbers<[1], [0], [0], [1], [0, 0, 1, 1], [], []>} : vector<8x8xf32>, vector<8x8xf32>, vector<8x8xf32> -> vector<8x8xf32>
    %218 = vector.extract_strided_slice %200 {offsets = [0, 0], sizes = [8, 32], strides = [1, 1]} : vector<32x32xf32> to vector<8x32xf32>
    %cst_102 = arith.constant dense<0.000000e+00> : vector<8x32xf32>
    %219 = tpu.matmul %217, %218, %cst_102 {dimension_numbers = #tpu.dot_dimension_numbers<[1], [0], [0], [1], [0, 0, 1, 1], [], []>} : vector<8x8xf32>, vector<8x32xf32>, vector<8x32xf32> -> vector<8x32xf32>
    %220 = arith.addf %201, %219 : vector<8x32xf32>
    %221 = vector.extract_strided_slice %198 {offsets = [0, 8], sizes = [8, 8], strides = [1, 1]} : vector<8x96xf32> to vector<8x8xf32>
    %222 = vector.extract_strided_slice %198 {offsets = [0, 40], sizes = [8, 8], strides = [1, 1]} : vector<8x96xf32> to vector<8x8xf32>
    %223 = vector.extract_strided_slice %198 {offsets = [0, 72], sizes = [8, 8], strides = [1, 1]} : vector<8x96xf32> to vector<8x8xf32>
    %cst_103 = arith.constant dense<0.000000e+00> : vector<8x8xf32>
    %224 = tpu.matmul %221, %222, %cst_103 {dimension_numbers = #tpu.dot_dimension_numbers<[1], [1], [0], [0], [0, 0, 1, 0], [], []>} : vector<8x8xf32>, vector<8x8xf32>, vector<8x8xf32> -> vector<8x8xf32>
    %cst_104 = arith.constant 0.353553385 : f32
    %225 = vector.broadcast %cst_104 : f32 to vector<8x8xf32>
    %226 = arith.mulf %224, %225 : vector<8x8xf32>
    %cst_105 = arith.constant dense<0xFF800000> : vector<8xf32>
    %227 = vector.multi_reduction <maximumf>, %226, %cst_105 [1] : vector<8x8xf32> to vector<8xf32>
    %228 = vector.shape_cast %227 : vector<8xf32> to vector<8x1xf32>
    %229 = vector.broadcast %228 : vector<8x1xf32> to vector<8x8xf32>
    %230 = arith.subf %226, %229 : vector<8x8xf32>
    %231 = math.exp %230 : vector<8x8xf32>
    %cst_106 = arith.constant dense<0.000000e+00> : vector<8xf32>
    %232 = vector.multi_reduction <add>, %231, %cst_106 [1] : vector<8x8xf32> to vector<8xf32>
    %233 = vector.shape_cast %232 : vector<8xf32> to vector<8x1xf32>
    %234 = vector.broadcast %233 : vector<8x1xf32> to vector<8x8xf32>
    %235 = arith.divf %231, %234 : vector<8x8xf32>
    %cst_107 = arith.constant dense<0.000000e+00> : vector<8x8xf32>
    %236 = tpu.matmul %235, %223, %cst_107 {dimension_numbers = #tpu.dot_dimension_numbers<[1], [0], [0], [1], [0, 0, 1, 1], [], []>} : vector<8x8xf32>, vector<8x8xf32>, vector<8x8xf32> -> vector<8x8xf32>
    %237 = vector.extract_strided_slice %200 {offsets = [8, 0], sizes = [8, 32], strides = [1, 1]} : vector<32x32xf32> to vector<8x32xf32>
    %cst_108 = arith.constant dense<0.000000e+00> : vector<8x32xf32>
    %238 = tpu.matmul %236, %237, %cst_108 {dimension_numbers = #tpu.dot_dimension_numbers<[1], [0], [0], [1], [0, 0, 1, 1], [], []>} : vector<8x8xf32>, vector<8x32xf32>, vector<8x32xf32> -> vector<8x32xf32>
    %239 = arith.addf %220, %238 : vector<8x32xf32>
    %240 = vector.extract_strided_slice %198 {offsets = [0, 16], sizes = [8, 8], strides = [1, 1]} : vector<8x96xf32> to vector<8x8xf32>
    %241 = vector.extract_strided_slice %198 {offsets = [0, 48], sizes = [8, 8], strides = [1, 1]} : vector<8x96xf32> to vector<8x8xf32>
    %242 = vector.extract_strided_slice %198 {offsets = [0, 80], sizes = [8, 8], strides = [1, 1]} : vector<8x96xf32> to vector<8x8xf32>
    %cst_109 = arith.constant dense<0.000000e+00> : vector<8x8xf32>
    %243 = tpu.matmul %240, %241, %cst_109 {dimension_numbers = #tpu.dot_dimension_numbers<[1], [1], [0], [0], [0, 0, 1, 0], [], []>} : vector<8x8xf32>, vector<8x8xf32>, vector<8x8xf32> -> vector<8x8xf32>
    %cst_110 = arith.constant 0.353553385 : f32
    %244 = vector.broadcast %cst_110 : f32 to vector<8x8xf32>
    %245 = arith.mulf %243, %244 : vector<8x8xf32>
    %cst_111 = arith.constant dense<0xFF800000> : vector<8xf32>
    %246 = vector.multi_reduction <maximumf>, %245, %cst_111 [1] : vector<8x8xf32> to vector<8xf32>
    %247 = vector.shape_cast %246 : vector<8xf32> to vector<8x1xf32>
    %248 = vector.broadcast %247 : vector<8x1xf32> to vector<8x8xf32>
    %249 = arith.subf %245, %248 : vector<8x8xf32>
    %250 = math.exp %249 : vector<8x8xf32>
    %cst_112 = arith.constant dense<0.000000e+00> : vector<8xf32>
    %251 = vector.multi_reduction <add>, %250, %cst_112 [1] : vector<8x8xf32> to vector<8xf32>
    %252 = vector.shape_cast %251 : vector<8xf32> to vector<8x1xf32>
    %253 = vector.broadcast %252 : vector<8x1xf32> to vector<8x8xf32>
    %254 = arith.divf %250, %253 : vector<8x8xf32>
    %cst_113 = arith.constant dense<0.000000e+00> : vector<8x8xf32>
    %255 = tpu.matmul %254, %242, %cst_113 {dimension_numbers = #tpu.dot_dimension_numbers<[1], [0], [0], [1], [0, 0, 1, 1], [], []>} : vector<8x8xf32>, vector<8x8xf32>, vector<8x8xf32> -> vector<8x8xf32>
    %256 = vector.extract_strided_slice %200 {offsets = [16, 0], sizes = [8, 32], strides = [1, 1]} : vector<32x32xf32> to vector<8x32xf32>
    %cst_114 = arith.constant dense<0.000000e+00> : vector<8x32xf32>
    %257 = tpu.matmul %255, %256, %cst_114 {dimension_numbers = #tpu.dot_dimension_numbers<[1], [0], [0], [1], [0, 0, 1, 1], [], []>} : vector<8x8xf32>, vector<8x32xf32>, vector<8x32xf32> -> vector<8x32xf32>
    %258 = arith.addf %239, %257 : vector<8x32xf32>
    %259 = vector.extract_strided_slice %198 {offsets = [0, 24], sizes = [8, 8], strides = [1, 1]} : vector<8x96xf32> to vector<8x8xf32>
    %260 = vector.extract_strided_slice %198 {offsets = [0, 56], sizes = [8, 8], strides = [1, 1]} : vector<8x96xf32> to vector<8x8xf32>
    %261 = vector.extract_strided_slice %198 {offsets = [0, 88], sizes = [8, 8], strides = [1, 1]} : vector<8x96xf32> to vector<8x8xf32>
    %cst_115 = arith.constant dense<0.000000e+00> : vector<8x8xf32>
    %262 = tpu.matmul %259, %260, %cst_115 {dimension_numbers = #tpu.dot_dimension_numbers<[1], [1], [0], [0], [0, 0, 1, 0], [], []>} : vector<8x8xf32>, vector<8x8xf32>, vector<8x8xf32> -> vector<8x8xf32>
    %cst_116 = arith.constant 0.353553385 : f32
    %263 = vector.broadcast %cst_116 : f32 to vector<8x8xf32>
    %264 = arith.mulf %262, %263 : vector<8x8xf32>
    %cst_117 = arith.constant dense<0xFF800000> : vector<8xf32>
    %265 = vector.multi_reduction <maximumf>, %264, %cst_117 [1] : vector<8x8xf32> to vector<8xf32>
    %266 = vector.shape_cast %265 : vector<8xf32> to vector<8x1xf32>
    %267 = vector.broadcast %266 : vector<8x1xf32> to vector<8x8xf32>
    %268 = arith.subf %264, %267 : vector<8x8xf32>
    %269 = math.exp %268 : vector<8x8xf32>
    %cst_118 = arith.constant dense<0.000000e+00> : vector<8xf32>
    %270 = vector.multi_reduction <add>, %269, %cst_118 [1] : vector<8x8xf32> to vector<8xf32>
    %271 = vector.shape_cast %270 : vector<8xf32> to vector<8x1xf32>
    %272 = vector.broadcast %271 : vector<8x1xf32> to vector<8x8xf32>
    %273 = arith.divf %269, %272 : vector<8x8xf32>
    %cst_119 = arith.constant dense<0.000000e+00> : vector<8x8xf32>
    %274 = tpu.matmul %273, %261, %cst_119 {dimension_numbers = #tpu.dot_dimension_numbers<[1], [0], [0], [1], [0, 0, 1, 1], [], []>} : vector<8x8xf32>, vector<8x8xf32>, vector<8x8xf32> -> vector<8x8xf32>
    %275 = vector.extract_strided_slice %200 {offsets = [24, 0], sizes = [8, 32], strides = [1, 1]} : vector<32x32xf32> to vector<8x32xf32>
    %cst_120 = arith.constant dense<0.000000e+00> : vector<8x32xf32>
    %276 = tpu.matmul %274, %275, %cst_120 {dimension_numbers = #tpu.dot_dimension_numbers<[1], [0], [0], [1], [0, 0, 1, 1], [], []>} : vector<8x8xf32>, vector<8x32xf32>, vector<8x32xf32> -> vector<8x32xf32>
    %277 = arith.addf %258, %276 : vector<8x32xf32>
    %c1_121 = arith.constant 1 : index
    %c0_122 = arith.constant 0 : index
    %c0_123 = arith.constant 0 : index
    %278 = vector.load %arg7[%c1_121, %c0_122, %c0_123] : memref<2x1x32xf32, #tpu.memory_space<vmem>>, vector<1x1x32xf32>
    %279 = vector.shape_cast %278 : vector<1x1x32xf32> to vector<1x32xf32>
    %280 = vector.broadcast %279 : vector<1x32xf32> to vector<8x32xf32>
    %281 = arith.addf %277, %280 : vector<8x32xf32>
    %282 = arith.addf %191, %281 : vector<8x32xf32>
    %c1_124 = arith.constant 1 : index
    %c0_125 = arith.constant 0 : index
    %c0_126 = arith.constant 0 : index
    %283 = vector.load %arg8[%c1_124, %c0_125, %c0_126] : memref<2x1x32xf32, #tpu.memory_space<vmem>>, vector<1x1x32xf32>
    %284 = vector.shape_cast %283 : vector<1x1x32xf32> to vector<1x32xf32>
    %c1_127 = arith.constant 1 : index
    %c0_128 = arith.constant 0 : index
    %c0_129 = arith.constant 0 : index
    %285 = vector.load %arg9[%c1_127, %c0_128, %c0_129] : memref<2x1x32xf32, #tpu.memory_space<vmem>>, vector<1x1x32xf32>
    %286 = vector.shape_cast %285 : vector<1x1x32xf32> to vector<1x32xf32>
    %cst_130 = arith.constant dense<0.000000e+00> : vector<8xf32>
    %287 = vector.multi_reduction <add>, %282, %cst_130 [1] : vector<8x32xf32> to vector<8xf32>
    %288 = vector.shape_cast %287 : vector<8xf32> to vector<8x1xf32>
    %cst_131 = arith.constant 3.200000e+01 : f32
    %289 = vector.broadcast %cst_131 : f32 to vector<8x1xf32>
    %290 = arith.divf %288, %289 : vector<8x1xf32>
    %291 = vector.broadcast %290 : vector<8x1xf32> to vector<8x32xf32>
    %292 = arith.subf %282, %291 : vector<8x32xf32>
    %293 = arith.mulf %292, %292 : vector<8x32xf32>
    %cst_132 = arith.constant dense<0.000000e+00> : vector<8xf32>
    %294 = vector.multi_reduction <add>, %293, %cst_132 [1] : vector<8x32xf32> to vector<8xf32>
    %295 = vector.shape_cast %294 : vector<8xf32> to vector<8x1xf32>
    %cst_133 = arith.constant 3.200000e+01 : f32
    %296 = vector.broadcast %cst_133 : f32 to vector<8x1xf32>
    %297 = arith.divf %295, %296 : vector<8x1xf32>
    %298 = vector.broadcast %290 : vector<8x1xf32> to vector<8x32xf32>
    %299 = arith.subf %282, %298 : vector<8x32xf32>
    %cst_134 = arith.constant 9.99999996E-13 : f32
    %300 = vector.broadcast %cst_134 : f32 to vector<8x1xf32>
    %301 = arith.addf %297, %300 : vector<8x1xf32>
    %302 = math.rsqrt %301 : vector<8x1xf32>
    %303 = vector.broadcast %302 : vector<8x1xf32> to vector<8x32xf32>
    %304 = arith.mulf %299, %303 : vector<8x32xf32>
    %305 = vector.broadcast %284 : vector<1x32xf32> to vector<8x32xf32>
    %306 = arith.mulf %304, %305 : vector<8x32xf32>
    %307 = vector.broadcast %286 : vector<1x32xf32> to vector<8x32xf32>
    %308 = arith.addf %306, %307 : vector<8x32xf32>
    %c1_135 = arith.constant 1 : index
    %c0_136 = arith.constant 0 : index
    %c0_137 = arith.constant 0 : index
    %309 = vector.load %arg10[%c1_135, %c0_136, %c0_137] : memref<2x32x64xf32, #tpu.memory_space<vmem>>, vector<1x32x64xf32>
    %310 = vector.shape_cast %309 : vector<1x32x64xf32> to vector<32x64xf32>
    %cst_138 = arith.constant dense<0.000000e+00> : vector<8x64xf32>
    %311 = tpu.matmul %308, %310, %cst_138 {dimension_numbers = #tpu.dot_dimension_numbers<[1], [0], [0], [1], [0, 0, 1, 1], [], []>} : vector<8x32xf32>, vector<32x64xf32>, vector<8x64xf32> -> vector<8x64xf32>
    %c1_139 = arith.constant 1 : index
    %c0_140 = arith.constant 0 : index
    %c0_141 = arith.constant 0 : index
    %312 = vector.load %arg11[%c1_139, %c0_140, %c0_141] : memref<2x1x64xf32, #tpu.memory_space<vmem>>, vector<1x1x64xf32>
    %313 = vector.shape_cast %312 : vector<1x1x64xf32> to vector<1x64xf32>
    %314 = vector.broadcast %313 : vector<1x64xf32> to vector<8x64xf32>
    %315 = arith.addf %311, %314 : vector<8x64xf32>
    %cst_142 = arith.constant 5.000000e-01 : f32
    %316 = vector.broadcast %cst_142 : f32 to vector<8x64xf32>
    %317 = arith.mulf %316, %315 : vector<8x64xf32>
    %cst_143 = arith.constant 0.707106769 : f32
    %318 = vector.broadcast %cst_143 : f32 to vector<8x64xf32>
    %319 = arith.mulf %315, %318 : vector<8x64xf32>
    %320 = math.erf %319 : vector<8x64xf32>
    %cst_144 = arith.constant 1.000000e+00 : f32
    %321 = vector.broadcast %cst_144 : f32 to vector<8x64xf32>
    %322 = arith.addf %321, %320 : vector<8x64xf32>
    %323 = arith.mulf %317, %322 : vector<8x64xf32>
    %c1_145 = arith.constant 1 : index
    %c0_146 = arith.constant 0 : index
    %c0_147 = arith.constant 0 : index
    %324 = vector.load %arg12[%c1_145, %c0_146, %c0_147] : memref<2x64x32xf32, #tpu.memory_space<vmem>>, vector<1x64x32xf32>
    %325 = vector.shape_cast %324 : vector<1x64x32xf32> to vector<64x32xf32>
    %cst_148 = arith.constant dense<0.000000e+00> : vector<8x32xf32>
    %326 = tpu.matmul %323, %325, %cst_148 {dimension_numbers = #tpu.dot_dimension_numbers<[1], [0], [0], [1], [0, 0, 1, 1], [], []>} : vector<8x64xf32>, vector<64x32xf32>, vector<8x32xf32> -> vector<8x32xf32>
    %c1_149 = arith.constant 1 : index
    %c0_150 = arith.constant 0 : index
    %c0_151 = arith.constant 0 : index
    %327 = vector.load %arg13[%c1_149, %c0_150, %c0_151] : memref<2x1x32xf32, #tpu.memory_space<vmem>>, vector<1x1x32xf32>
    %328 = vector.shape_cast %327 : vector<1x1x32xf32> to vector<1x32xf32>
    %329 = vector.broadcast %328 : vector<1x32xf32> to vector<8x32xf32>
    %330 = arith.addf %326, %329 : vector<8x32xf32>
    %331 = arith.addf %308, %330 : vector<8x32xf32>
    %c1_152 = arith.constant 1 : index
    %c0_153 = arith.constant 0 : index
    %c0_154 = arith.constant 0 : index
    %332 = vector.load %arg14[%c1_152, %c0_153, %c0_154] : memref<2x1x32xf32, #tpu.memory_space<vmem>>, vector<1x1x32xf32>
    %333 = vector.shape_cast %332 : vector<1x1x32xf32> to vector<1x32xf32>
    %c1_155 = arith.constant 1 : index
    %c0_156 = arith.constant 0 : index
    %c0_157 = arith.constant 0 : index
    %334 = vector.load %arg15[%c1_155, %c0_156, %c0_157] : memref<2x1x32xf32, #tpu.memory_space<vmem>>, vector<1x1x32xf32>
    %335 = vector.shape_cast %334 : vector<1x1x32xf32> to vector<1x32xf32>
    %cst_158 = arith.constant dense<0.000000e+00> : vector<8xf32>
    %336 = vector.multi_reduction <add>, %331, %cst_158 [1] : vector<8x32xf32> to vector<8xf32>
    %337 = vector.shape_cast %336 : vector<8xf32> to vector<8x1xf32>
    %cst_159 = arith.constant 3.200000e+01 : f32
    %338 = vector.broadcast %cst_159 : f32 to vector<8x1xf32>
    %339 = arith.divf %337, %338 : vector<8x1xf32>
    %340 = vector.broadcast %339 : vector<8x1xf32> to vector<8x32xf32>
    %341 = arith.subf %331, %340 : vector<8x32xf32>
    %342 = arith.mulf %341, %341 : vector<8x32xf32>
    %cst_160 = arith.constant dense<0.000000e+00> : vector<8xf32>
    %343 = vector.multi_reduction <add>, %342, %cst_160 [1] : vector<8x32xf32> to vector<8xf32>
    %344 = vector.shape_cast %343 : vector<8xf32> to vector<8x1xf32>
    %cst_161 = arith.constant 3.200000e+01 : f32
    %345 = vector.broadcast %cst_161 : f32 to vector<8x1xf32>
    %346 = arith.divf %344, %345 : vector<8x1xf32>
    %347 = vector.broadcast %339 : vector<8x1xf32> to vector<8x32xf32>
    %348 = arith.subf %331, %347 : vector<8x32xf32>
    %cst_162 = arith.constant 9.99999996E-13 : f32
    %349 = vector.broadcast %cst_162 : f32 to vector<8x1xf32>
    %350 = arith.addf %346, %349 : vector<8x1xf32>
    %351 = math.rsqrt %350 : vector<8x1xf32>
    %352 = vector.broadcast %351 : vector<8x1xf32> to vector<8x32xf32>
    %353 = arith.mulf %348, %352 : vector<8x32xf32>
    %354 = vector.broadcast %333 : vector<1x32xf32> to vector<8x32xf32>
    %355 = arith.mulf %353, %354 : vector<8x32xf32>
    %356 = vector.broadcast %335 : vector<1x32xf32> to vector<8x32xf32>
    %357 = arith.addf %355, %356 : vector<8x32xf32>
    %358 = vector.extract_strided_slice %357 {offsets = [0, 0], sizes = [1, 32], strides = [1, 1]} : vector<8x32xf32> to vector<1x32xf32>
    %c0_163 = arith.constant 0 : index
    %c0_164 = arith.constant 0 : index
    %359 = vector.load %arg16[%c0_163, %c0_164] : memref<32x3xf32, #tpu.memory_space<vmem>>, vector<32x3xf32>
    %cst_165 = arith.constant dense<0.000000e+00> : vector<1x3xf32>
    %360 = tpu.matmul %358, %359, %cst_165 {dimension_numbers = #tpu.dot_dimension_numbers<[1], [0], [0], [1], [0, 0, 1, 1], [], []>} : vector<1x32xf32>, vector<32x3xf32>, vector<1x3xf32> -> vector<1x3xf32>
    %c0_166 = arith.constant 0 : index
    %c0_167 = arith.constant 0 : index
    %361 = vector.load %arg17[%c0_166, %c0_167] : memref<1x3xf32, #tpu.memory_space<vmem>>, vector<1x3xf32>
    %362 = arith.addf %360, %361 : vector<1x3xf32>
    %c0_168 = arith.constant 0 : index
    %c0_169 = arith.constant 0 : index
    %c0_170 = arith.constant 0 : index
    %363 = vector.load %arg18[%c0_168, %c0_169, %c0_170] : memref<1x1x3xf32, #tpu.memory_space<vmem>>, vector<1x1x3xf32>
    %364 = vector.shape_cast %363 : vector<1x1x3xf32> to vector<1x3xf32>
    %365 = vector.shape_cast %362 : vector<1x3xf32> to vector<1x1x3xf32>
    tpu.vector_store %arg18[%c0_168, %c0_169, %c0_170], %365 {strides = array<i32>} : memref<1x1x3xf32, #tpu.memory_space<vmem>>, vector<1x1x3xf32>,
    return
  }
  func.func @transform_0(%arg0: i32) -> (i32, i32, i32) {
    %c0_i32 = arith.constant 0 : i32
    %c0_i32_0 = arith.constant 0 : i32
    %c0_i32_1 = arith.constant 0 : i32
    return %arg0, %c0_i32, %c0_i32_0 : i32, i32, i32
  }
  func.func @transform_1(%arg0: i32) -> (i32, i32) {
    %c0_i32 = arith.constant 0 : i32
    %c0_i32_0 = arith.constant 0 : i32
    %c0_i32_1 = arith.constant 0 : i32
    return %c0_i32, %c0_i32_0 : i32, i32
  }
  func.func @transform_2(%arg0: i32) -> (i32, i32) {
    %c0_i32 = arith.constant 0 : i32
    %c0_i32_0 = arith.constant 0 : i32
    %c0_i32_1 = arith.constant 0 : i32
    return %c0_i32, %c0_i32_0 : i32, i32
  }
  func.func @transform_3(%arg0: i32) -> (i32, i32, i32) {
    %c0_i32 = arith.constant 0 : i32
    %c0_i32_0 = arith.constant 0 : i32
    %c0_i32_1 = arith.constant 0 : i32
    %c0_i32_2 = arith.constant 0 : i32
    return %c0_i32, %c0_i32_0, %c0_i32_1 : i32, i32, i32
  }
  func.func @transform_4(%arg0: i32) -> (i32, i32, i32) {
    %c0_i32 = arith.constant 0 : i32
    %c0_i32_0 = arith.constant 0 : i32
    %c0_i32_1 = arith.constant 0 : i32
    %c0_i32_2 = arith.constant 0 : i32
    return %c0_i32, %c0_i32_0, %c0_i32_1 : i32, i32, i32
  }
  func.func @transform_5(%arg0: i32) -> (i32, i32, i32) {
    %c0_i32 = arith.constant 0 : i32
    %c0_i32_0 = arith.constant 0 : i32
    %c0_i32_1 = arith.constant 0 : i32
    %c0_i32_2 = arith.constant 0 : i32
    return %c0_i32, %c0_i32_0, %c0_i32_1 : i32, i32, i32
  }
  func.func @transform_6(%arg0: i32) -> (i32, i32, i32) {
    %c0_i32 = arith.constant 0 : i32
    %c0_i32_0 = arith.constant 0 : i32
    %c0_i32_1 = arith.constant 0 : i32
    %c0_i32_2 = arith.constant 0 : i32
    return %c0_i32, %c0_i32_0, %c0_i32_1 : i32, i32, i32
  }
  func.func @transform_7(%arg0: i32) -> (i32, i32, i32) {
    %c0_i32 = arith.constant 0 : i32
    %c0_i32_0 = arith.constant 0 : i32
    %c0_i32_1 = arith.constant 0 : i32
    %c0_i32_2 = arith.constant 0 : i32
    return %c0_i32, %c0_i32_0, %c0_i32_1 : i32, i32, i32
  }
  func.func @transform_8(%arg0: i32) -> (i32, i32, i32) {
    %c0_i32 = arith.constant 0 : i32
    %c0_i32_0 = arith.constant 0 : i32
    %c0_i32_1 = arith.constant 0 : i32
    %c0_i32_2 = arith.constant 0 : i32
    return %c0_i32, %c0_i32_0, %c0_i32_1 : i32, i32, i32
  }
  func.func @transform_9(%arg0: i32) -> (i32, i32, i32) {
    %c0_i32 = arith.constant 0 : i32
    %c0_i32_0 = arith.constant 0 : i32
    %c0_i32_1 = arith.constant 0 : i32
    %c0_i32_2 = arith.constant 0 : i32
    return %c0_i32, %c0_i32_0, %c0_i32_1 : i32, i32, i32
  }
  func.func @transform_10(%arg0: i32) -> (i32, i32, i32) {
    %c0_i32 = arith.constant 0 : i32
    %c0_i32_0 = arith.constant 0 : i32
    %c0_i32_1 = arith.constant 0 : i32
    %c0_i32_2 = arith.constant 0 : i32
    return %c0_i32, %c0_i32_0, %c0_i32_1 : i32, i32, i32
  }
  func.func @transform_11(%arg0: i32) -> (i32, i32, i32) {
    %c0_i32 = arith.constant 0 : i32
    %c0_i32_0 = arith.constant 0 : i32
    %c0_i32_1 = arith.constant 0 : i32
    %c0_i32_2 = arith.constant 0 : i32
    return %c0_i32, %c0_i32_0, %c0_i32_1 : i32, i32, i32
  }
  func.func @transform_12(%arg0: i32) -> (i32, i32, i32) {
    %c0_i32 = arith.constant 0 : i32
    %c0_i32_0 = arith.constant 0 : i32
    %c0_i32_1 = arith.constant 0 : i32
    %c0_i32_2 = arith.constant 0 : i32
    return %c0_i32, %c0_i32_0, %c0_i32_1 : i32, i32, i32
  }
  func.func @transform_13(%arg0: i32) -> (i32, i32, i32) {
    %c0_i32 = arith.constant 0 : i32
    %c0_i32_0 = arith.constant 0 : i32
    %c0_i32_1 = arith.constant 0 : i32
    %c0_i32_2 = arith.constant 0 : i32
    return %c0_i32, %c0_i32_0, %c0_i32_1 : i32, i32, i32
  }
  func.func @transform_14(%arg0: i32) -> (i32, i32, i32) {
    %c0_i32 = arith.constant 0 : i32
    %c0_i32_0 = arith.constant 0 : i32
    %c0_i32_1 = arith.constant 0 : i32
    %c0_i32_2 = arith.constant 0 : i32
    return %c0_i32, %c0_i32_0, %c0_i32_1 : i32, i32, i32
  }
  func.func @transform_15(%arg0: i32) -> (i32, i32) {
    %c0_i32 = arith.constant 0 : i32
    %c0_i32_0 = arith.constant 0 : i32
    %c0_i32_1 = arith.constant 0 : i32
    return %c0_i32, %c0_i32_0 : i32, i32
  }
  func.func @transform_16(%arg0: i32) -> (i32, i32) {
    %c0_i32 = arith.constant 0 : i32
    %c0_i32_0 = arith.constant 0 : i32
    %c0_i32_1 = arith.constant 0 : i32
    return %c0_i32, %c0_i32_0 : i32, i32
  }
  func.func @transform_17(%arg0: i32) -> (i32, i32, i32) {
    %c0_i32 = arith.constant 0 : i32
    %c0_i32_0 = arith.constant 0 : i32
    %c0_i32_1 = arith.constant 0 : i32
    return %arg0, %c0_i32, %c0_i32_0 : i32, i32, i32
  }
}

</mosaic_0001>

<bundles_post_ra>
// kernel: xnli_forward.1
= control target key start
LH: loop header
LB: loop body
LE: loop exit
PB: predicated region body
PF: predicated region fallthrough
CT: control target
= control target key end

     0   :  { %s4505_s0 = inlined_call_operand.vmem [shape: f32[2,8,32], index: 0, kind: input, shape index: {}]   ;;  %s4506_s1 = inlined_call_operand.vmem [shape: f32[1,32], index: 1, kind: input, shape index: {}]   ;;  %s4507_s2 = inlined_call_operand.vmem [shape: f32[1,32], index: 2, kind: input, shape index: {}]   ;;  %s4508_s3 = inlined_call_operand.vmem [shape: f32[2,32,96], index: 3, kind: input, shape index: {}]   ;;  %s4509_s4 = inlined_call_operand.vmem [shape: f32[2,1,96], index: 4, kind: input, shape index: {}]   ;;  %s4510_s5 = inlined_call_operand.vmem [shape: f32[2,32,32], index: 5, kind: input, shape index: {}]   ;;  %s4511_s6 = inlined_call_operand.vmem [shape: f32[2,1,32], index: 6, kind: input, shape index: {}]   ;;  %s4512_s7 = inlined_call_operand.vmem [shape: f32[2,1,32], index: 7, kind: input, shape index: {}]   ;;  %s4513_s8 = inlined_call_operand.vmem [shape: f32[2,1,32], index: 8, kind: input, shape index: {}]   ;;  %s4514_s9 = inlined_call_operand.vmem [shape: f32[2,32,64], index: 9, kind: input, shape index: {}]   ;;  %s4515_s10 = inlined_call_operand.vmem [shape: f32[2,1,64], index: 10, kind: input, shape index: {}]   ;;  %s4516_s11 = inlined_call_operand.vmem [shape: f32[2,64,32], index: 11, kind: input, shape index: {}]   ;;  %s4517_s12 = inlined_call_operand.vmem [shape: f32[2,1,32], index: 12, kind: input, shape index: {}]   ;;  %s4518_s13 = inlined_call_operand.vmem [shape: f32[2,1,32], index: 13, kind: input, shape index: {}]   ;;  %s4519_s14 = inlined_call_operand.vmem [shape: f32[2,1,32], index: 14, kind: input, shape index: {}]   ;;  %s4520_s15 = inlined_call_operand.vmem [shape: f32[32,3], index: 15, kind: input, shape index: {}]   ;;  %s4521_s16 = inlined_call_operand.vmem [shape: f32[1,3], index: 16, kind: input, shape index: {}]   ;;  %s4522_s17 = inlined_call_operand.hbm [shape: f32[2,1,3], index: 17, kind: output, shape index: {}]  }
   0x1   :  { %4535 = sst [smem:[#allocation7_spill]] %s4505_s0 }
   0x2   :  { %4536 = sst [smem:[#allocation8_spill]] %s4506_s1 }
   0x3   :  { %4537 = sst [smem:[#allocation9_spill]] %s4507_s2 }
   0x4   :  { %4538 = sst [smem:[#allocation10_spill]] %s4508_s3 }
   0x5   :  { %4539 = sst [smem:[#allocation11_spill]] %s4509_s4 }
   0x6   :  { %22 = vsyncpa [#allocation3], 0 }
   0x7   :  { %24 = vsyncpa [#allocation3 + $0x1], 0  ;;  %s3978_s24 = smov 0   ;;  %s3980_s25 = smov 0  }
   0x8   :  { %s3982_s26 = smov 0   ;;  %s3984_s27 = smov 0  }
   0x9 LB: > { %4540 = sst [smem:[#allocation5_spill]] %s3868_s26  ;;  %s3999_s28 = sadd.s32 4294967295, %s3872_s27   ;;  %s3872_s27 = sphi %s3984_s27, %s4564_s27   ;;  %s3868_s26 = sphi %s3982_s26, %s4561_s26   ;;  %s3864_s25 = sphi %s3980_s25, %s4563_s25   ;;  %s3860_s24 = sphi %s3978_s24, %s4562_s24  }
   0xa   : > { %s3317_s29 = sadd.s32 4294967294, %s3872_s27   ;;  %s4003_s0 = sadd.s32 1, %s3872_s27  }
   0xb   : > { %s399_s30 = sadd.s32 1, %s3868_s26  ;;  %s396_s18 = ssub.s32 %s3872_s27, %s4003_s0 }
   0xc   : > { %p409_p0 = scmp.ne.s32.totalorder %s3868_s26, %s3864_s25  ;;  %p397_p1 = scmp.eq.s32.totalorder %s396_s18, 0 }
   0xd   : > { %p410_p2 = scmp.eq.s32.totalorder %s3999_s28, 1  ;;  %p415_p3 = scmp.ne.s32.totalorder %s3864_s25, %s3860_s24 }
   0xe   : > { %p416_p4 = scmp.eq.s32.totalorder %s3317_s29, 1  ;;  %p3320_p7 = scmp.ge.s32.totalorder %s3872_s27, 1 }
   0xf   : > { %s4014_s19 = scalar_select %p397_p1, %s3868_s26, %s399_s30  }
  0x10   : > { %p4016_p5 = por %p410_p2, %p409_p0  ;;  %p4020_p6 = por %p416_p4, %p415_p3 }
  0x11   : > { %4541 = sst [smem:[#allocation6_spill]] %s4014_s19  ;;  %p489_p8 = scmp.lt.s32.totalorder %s3872_s27, 3 }
  0x13   : > { %p490_p9 = pnand %p3320_p7, %p489_p8 }
  0x14   : > { %p539_p10 = scmp.lt.s32.totalorder (!%p490_p9), %s3999_s28, 1  ;;  %s4544_s30 = sld [smem:[#allocation7_spill]] (!%p490_p9) }
  0x15   : > { %493 = sbr.rel (%p490_p9) target bundleno = 7465 (0x1d29), region = 88  ;;  %s4545_s3 = sld [smem:[#allocation10_spill]] (!%p490_p9) }
  0x16   : > { %s4547_s2 = sld [smem:[#allocation9_spill]] (!%p490_p9)  ;;  %s4532_s19 = smov (!%p490_p9), 120  }
  0x17   : > { %s4548_s4 = sld [smem:[#allocation11_spill]] (!%p490_p9)  ;;  %s4526_s23 = smov (!%p490_p9), 80  }
  0x18   : > { %s4524_s29 = smov (!%p490_p9), 112   ;;  %s4550_s26 = smov (!%p490_p9), 96  }
  0x1a   : > { %s540_s21 = scalar_select %p539_p10, %s3999_s28, 1  ;;  %vm546_vm0 = vcmask 261120   ;;  %v3874_v8 = vmov 0.0   ;;  %vm3875_vm1 = vmmov 0   ;;  %vm666_vm2 = vcmask 64512   ;;  %v659_v54 = vld [vmem:[%s4510_s5] sm:$0xff] }
  0x1b   : > { %v578_v7 = vld [vmem:[%s4545_s3 + $0x18] sm:$0xff]  ;;  %3501 = vmatprep.subr.mxu0 %v3874_v8  ;;  %v577_v9 = vld [vmem:[%s4545_s3 + $0x10] sm:$0xff]  ;;  %3509 = vmatprep.mubr.msk.f32.mxu0 %vm3875_vm1, %v3874_v8  ;;  %v576_v10 = vld [vmem:[%s4545_s3 + $0x8] sm:$0xff]  ;;  %vm1763_vm3 = vcmask 523264   ;;  %vm3247_vm4 = vcmask 16384  }
  0x1c   : > { %s3321_s22 = sshll.u32 %s540_s21, 3  ;;  %3502 = vmatpush3.msra.mxu0 %v578_v7  ;;  %3512 = vmatprep.subr.mxu1 %v3874_v8  ;;  %v575_v11 = vld [vmem:[%s4545_s3] sm:$0xff]  ;;  %s4546_s21 = sld [smem:[#allocation8_spill]]  ;;  %v660_v55 = vld [vmem:[%s4510_s5 + $0x8] sm:$0xff] }
  0x1d   : > { %s542_s18 = scalar_lea.vmem %s4544_s30, %s3321_s22  ;;  %3503 = vmatprep.subr.mxu0 %v3874_v8  ;;  %3514 = vmatprep.mubr.msk.f32.mxu1 %vm3875_vm1, %v3874_v8  ;;  %v3323_v18 = vld [vmem:[%s4547_s2] ss:$0 sm:$0xff]  ;;  %s4533_s30 = smov 96  }
  0x1e   : > { %v543_v0 = vld [vmem:[%s542_s18] sm:$0xff]  ;;  %3504 = vmatpush3.msra.mxu0 %v577_v9  ;;  %s4534_s18 = smov 88   ;;  %s4525_s22 = smov 64  }
  0x1f   : > { %v547_v1 = vsel %vm546_vm0, %v543_v0, 0.0  ;;  %3505 = vmatprep.subr.mxu0 %v3874_v8  ;;  %v3324_v21 = vld [vmem:[%s4548_s4] ss:$0 sm:$0xff] }
  0x20   : > { %548 = vadd.xlane.f32.xlu0 %v547_v1  ;;  %3506 = vmatpush3.msra.mxu0 %v576_v10 }
  0x21   : > { %3507 = vmatprep.subr.mxu0 %v3874_v8 }
  0x22   : > { %3508 = vmatpush3.msra.mxu0 %v575_v11  ;;  %v3322_v16 = vld [vmem:[%s4546_s21] ss:$0 sm:$0xff]  ;;  %s4531_s21 = smov 56  }
  0x23   : > { %3522 = vmatprep.subr.mxu0 %v3874_v8 }
  0xa9   : > { %v549_v2 = vpop.xlane.xlu0 %548 }
  0xaa   : > { %v551_v3 = vmul.f32 0.03125, %v549_v2 }
  0xac   : > { %v552_v4 = vsub.f32 %v543_v0, %v551_v3 }
  0xae   : > { %v553_v5 = vmul.f32 %v552_v4, %v552_v4 }
  0xb0   : > { %v554_v6 = vsel %vm546_vm0, %v553_v5, 0.0 }
  0xb1   : > { %555 = vadd.xlane.f32.xlu0 %v554_v6 }
 0x13a   : > { %v556_v12 = vpop.xlane.xlu0 %555 }
 0x13b   : > { %v557_v13 = vmul.f32 0.03125, %v556_v12 }
 0x13d   : > { %v558_v14 = vadd.f32 1e-12, %v557_v13 }
 0x13f   : > { %3766 = vrsqrt.f32 %v558_v14 }
 0x14c   : > { %v3767_v15 = vpop.eup %3766 }
 0x14d   : > { %v560_v17 = vmul.f32 %v3767_v15, %v552_v4 }
 0x14f   : > { %v567_v19 = vmul.f32 %v3322_v16, %v560_v17 }
 0x151   : > { %v4061_v20 = vadd.f32 %v3323_v18, %v567_v19  ;;  %v661_v19 = vld [vmem:[%s4510_s5 + $0x10] sm:$0xff] }
 0x153   : > { %3510 = vmatmul.mubr.msk.f32.vlgmr.msra.gmra.mxu0 %vm546_vm0, %v4061_v20 }
 0x154   : > { %3524 = vmatprep.mubr.msk.f32.mxu0 %vm3875_vm1, %v3874_v8 }
 0x213   : > { %v655_v22 = vpop.f32.mrf.mxu0 }
 0x214   : > { %v4070_v23 = vadd.f32 %v3324_v21, %v655_v22 }
 0x215   : > { %v3511_v24 = vpop.f32.mrf.mxu0 }
 0x216   : > { %829 = vrot.lane.b32.xlu0 %v4070_v23, %s4532_s19  ;;  %664 = vrot.lane.b32.xlu1 %v4070_v23, %s4533_s30  ;;  %s4551_s19 = smov 120   ;;  %s4555_s30 = smov 112  }
 0x21a   : > { %831 = vrot.lane.b32.xlu1 %v4070_v23, %s4534_s18 }
 0x288   : > { %v665_v25 = vpop.permute.xlu1 %664  ;;  %v830_v27 = vpop.permute.xlu0 %829 }
 0x289   : > { %3513 = vmatpush3.xpose.msk.msra.mxu1 %vm666_vm2, %v665_v25 }
 0x28a   : > { %3517 = vmatprep.subr.mxu1 %v3874_v8 }
 0x28c   : > { %3515 = vmatmul.mubr.msk.f32.vlgmr.msra.gmra.mxu1 %vm666_vm2, %v4070_v23  ;;  %v832_v26 = vpop.permute.xlu1 %831 }
 0x28d   : > { %3523 = vmatpush3.xpose.msk.msra.mxu0 %vm666_vm2, %v832_v26  ;;  %3519 = vmatprep.mubr.msk.f32.mxu1 %vm3875_vm1, %v3874_v8 }
 0x28e   : > { %3532 = vmatprep.subr.mxu0 %v3874_v8 }
 0x290   : > { %3525 = vmatmul.mubr.msk.f32.vlgmr.msra.gmra.mxu0 %vm666_vm2, %v830_v27 }
 0x291   : > { %3534 = vmatprep.mubr.msk.f32.mxu0 %vm3875_vm1, %v3874_v8  ;;  %3533 = vmatpush3.msra.mxu0 %v660_v55  ;;  %v1661_v55 = vld [vmem:[%s4514_s9 + $0x10] sm:$0xff] }
 0x292   : > { %3542 = vmatprep.subr.mxu0 %v3874_v8 }
 0x34c   : > { %v737_v28 = vpop.f32.mrf.mxu1 }
 0x34d   : > { %v741_v29 = vmul.f32 0.35355338, %v737_v28 }
 0x34e   : > { %v3516_v30 = vpop.f32.mrf.mxu1 }
 0x34f   : > { %v742_v31 = vsel %vm666_vm2, %v741_v29, -inf }
 0x350   : > { %743 = vmax.xlane.f32.xlu1 %v742_v31  ;;  %v903_v32 = vpop.f32.mrf.mxu0 }
 0x351   : > { %v907_v33 = vmul.f32 0.35355338, %v903_v32 }
 0x352   : > { %v3526_v34 = vpop.f32.mrf.mxu0 }
 0x353   : > { %v908_v35 = vsel %vm666_vm2, %v907_v33, -inf }
 0x354   : > { %909 = vmax.xlane.f32.xlu0 %v908_v35 }
 0x36a   : > { %919 = vrot.lane.b32.xlu0 %v4070_v23, %s4531_s21  ;;  %s4552_s21 = smov 56  }
 0x3d9   : > { %v744_v36 = vpop.xlane.xlu1 %743 }
 0x3da   : > { %v745_v37 = vsub.f32 %v741_v29, %v744_v36 }
 0x3dc   : > { %v746_v38 = vmul.f32 1.442695, %v745_v37 }
 0x3dd   : > { %v910_v39 = vpop.xlane.xlu0 %909 }
 0x3de   : > { %3768 = vpow2.f32 %v746_v38  ;;  %v911_v40 = vsub.f32 %v907_v33, %v910_v39  ;;  %v662_v33 = vld [vmem:[%s4510_s5 + $0x18] sm:$0xff] }
 0x3e0   : > { %v912_v41 = vmul.f32 1.442695, %v911_v40 }
 0x3e1   : > { %v920_v51 = vpop.permute.xlu0 %919 }
 0x3e2   : > { %3770 = vpow2.f32 %v912_v41 }
 0x3eb   : > { %v3769_v42 = vpop.eup %3768 }
 0x3ec   : > { %v748_v43 = vsel %vm666_vm2, %v3769_v42, 0.0 }
 0x3ed   : > { %749 = vadd.xlane.f32.xlu1 %v748_v43  ;;  %v3342_v43 = vld [vmem:[%s4511_s6] ss:$0 sm:$0xff] }
 0x3ef   : > { %v3771_v44 = vpop.eup %3770 }
 0x3f0   : > { %v914_v45 = vsel %vm666_vm2, %v3771_v44, 0.0 }
 0x3f1   : > { %915 = vadd.xlane.f32.xlu1 %v914_v45 }
 0x402   : > { %753 = vrot.lane.b32.xlu1 %v4070_v23, %s4525_s22  ;;  %s4527_s22 = smov 48  }
 0x406   : > { %1143 = vrot.lane.b32.xlu1 %v4070_v23, %s4526_s23  ;;  %s4528_s23 = smov 104  }
 0x40a   : > { %1141 = vrot.lane.b32.xlu1 %v4070_v23, %s4524_s29  ;;  %s4530_s29 = smov 72  }
 0x476   : > { %v750_v46 = vpop.xlane.xlu1 %749 }
 0x477   : > { %3772 = vrcp.f32 %v750_v46 }
 0x47a   : > { %v916_v47 = vpop.xlane.xlu1 %915 }
 0x47b   : > { %3774 = vrcp.f32 %v916_v47 }
 0x47e   : > { %v754_v48 = vpop.permute.xlu1 %753 }
 0x47f   : > { %3518 = vmatpush3.msra.mxu1 %v754_v48 }
 0x480   : > { %3527 = vmatprep.subr.mxu1 %v3874_v8 }
 0x482   : > { %v1144_v57 = vpop.permute.xlu1 %1143 }
 0x484   : > { %v3773_v49 = vpop.eup %3772 }
 0x485   : > { %v752_v50 = vmul.f32 %v3773_v49, %v3769_v42 }
 0x486   : > { %v1142_v61 = vpop.permute.xlu1 %1141 }
 0x487   : > { %3520 = vmatmul.mubr.msk.f32.vlgmr.msra.gmra.mxu1 %vm666_vm2, %v752_v50 }
 0x488   : > { %v3775_v52 = vpop.eup %3774  ;;  %3528 = vmatpush3.msra.mxu1 %v920_v51  ;;  %3529 = vmatprep.mubr.msk.f32.mxu1 %vm3875_vm1, %v3874_v8 }
 0x489   : > { %v918_v53 = vmul.f32 %v3775_v52, %v3771_v44  ;;  %3537 = vmatprep.subr.mxu1 %v3874_v8 }
 0x48b   : > { %3530 = vmatmul.mubr.msk.f32.vlgmr.msra.gmra.mxu1 %vm666_vm2, %v918_v53 }
 0x48c   : > { %3539 = vmatprep.mubr.msk.f32.mxu1 %vm3875_vm1, %v3874_v8  ;;  %3538 = vmatpush3.msra.mxu1 %v659_v54  ;;  %v1662_v54 = vld [vmem:[%s4514_s9 + $0x18] sm:$0xff] }
 0x48d   : > { %3547 = vmatprep.subr.mxu1 %v3874_v8 }
 0x547   : > { %v825_v56 = vpop.f32.mrf.mxu1 }
 0x548   : > { %3540 = vmatmul.mubr.msk.f32.vlgmr.msra.gmra.mxu1 %vm666_vm2, %v825_v56  ;;  %v1659_v56 = vld [vmem:[%s4514_s9] sm:$0xff] }
 0x549   : > { %v3521_v58 = vpop.f32.mrf.mxu1  ;;  %3549 = vmatprep.mubr.msk.f32.mxu1 %vm3875_vm1, %v3874_v8 }
 0x54b   : > { %v991_v59 = vpop.f32.mrf.mxu1 }
 0x54c   : > { %3535 = vmatmul.mubr.msk.f32.vlgmr.msra.gmra.mxu0 %vm666_vm2, %v991_v59 }
 0x54d   : > { %3543 = vmatpush3.xpose.msk.msra.mxu0 %vm666_vm2, %v1144_v57  ;;  %v3531_v60 = vpop.f32.mrf.mxu1  ;;  %3544 = vmatprep.mubr.msk.f32.mxu0 %vm3875_vm1, %v3874_v8 }
 0x54e   : > { %3552 = vmatprep.subr.mxu0 %v3874_v8 }
 0x550   : > { %3545 = vmatmul.mubr.msk.f32.vlgmr.msra.gmra.mxu0 %vm666_vm2, %v1142_v61  ;;  %v3343_v61 = vld [vmem:[%s4512_s7] ss:$0 sm:$0xff] }
 0x551   : > { %3554 = vmatprep.mubr.msk.f32.mxu0 %vm3875_vm1, %v3874_v8  ;;  %3553 = vmatpush3.msra.mxu0 %v661_v19 }
 0x552   : > { %3562 = vmatprep.subr.mxu0 %v3874_v8 }
 0x608   : > { %v1137_v62 = vpop.f32.mrf.mxu1 }
 0x60a   : > { %v3541_v63 = vpop.f32.mrf.mxu1 }
 0x60b   : > { %v3344_v63 = vld [vmem:[%s4513_s8] ss:$0 sm:$0xff] }
 0x60c   : > { %v1064_v0 = vpop.f32.mrf.mxu0 }
 0x60d   : > { %v1138_v1 = vadd.f32 %v1137_v62, %v1064_v0 }
 0x60e   : > { %v3536_v2 = vpop.f32.mrf.mxu0 }
 0x60f   : > { %v1755_v2 = vld [vmem:[%s4516_s11 + $0x38] sm:$0xff] }
 0x610   : > { %v1215_v3 = vpop.f32.mrf.mxu0 }
 0x611   : > { %v1219_v4 = vmul.f32 0.35355338, %v1215_v3  ;;  %v1754_v3 = vld [vmem:[%s4516_s11 + $0x30] sm:$0xff] }
 0x612   : > { %v3546_v5 = vpop.f32.mrf.mxu0 }
 0x613   : > { %v1220_v6 = vsel %vm666_vm2, %v1219_v4, -inf  ;;  %v1752_v5 = vld [vmem:[%s4516_s11 + $0x20] sm:$0xff] }
 0x614   : > { %1221 = vmax.xlane.f32.xlu1 %v1220_v6  ;;  %v1751_v6 = vld [vmem:[%s4516_s11 + $0x18] sm:$0xff] }
 0x625   : > { %1231 = vrot.lane.b32.xlu1 %v4070_v23, %s4527_s22  ;;  %s4529_s22 = smov 40  }
 0x629   : > { %1381 = vrot.lane.b32.xlu1 %v4070_v23, %s4528_s23  ;;  %s4549_s23 = smov 88  }
 0x69d   : > { %v1222_v7 = vpop.xlane.xlu1 %1221 }
 0x69e   : > { %v1223_v9 = vsub.f32 %v1219_v4, %v1222_v7  ;;  %v1753_v4 = vld [vmem:[%s4516_s11 + $0x28] sm:$0xff]  ;;  %v1750_v7 = vld [vmem:[%s4516_s11 + $0x10] sm:$0xff] }
 0x6a0   : > { %v1224_v10 = vmul.f32 1.442695, %v1223_v9  ;;  %v1749_v9 = vld [vmem:[%s4516_s11 + $0x8] sm:$0xff] }
 0x6a1   : > { %v1232_v11 = vpop.permute.xlu1 %1231 }
 0x6a2   : > { %3776 = vpow2.f32 %v1224_v10  ;;  %3548 = vmatpush3.msra.mxu1 %v1232_v11  ;;  %v1748_v10 = vld [vmem:[%s4516_s11] sm:$0xff] }
 0x6a3   : > { %3557 = vmatprep.subr.mxu1 %v3874_v8  ;;  %v3345_v11 = vld [vmem:[%s4515_s10] ss:$0 sm:$0xff] }
 0x6a5   : > { %v1382_v18 = vpop.permute.xlu1 %1381 }
 0x6af   : > { %v3777_v12 = vpop.eup %3776 }
 0x6b0   : > { %v1226_v13 = vsel %vm666_vm2, %v3777_v12, 0.0 }
 0x6b1   : > { %1227 = vadd.xlane.f32.xlu0 %v1226_v13 }
 0x6c7   : > { %1383 = vrot.lane.b32.xlu0 %v4070_v23, %s4530_s29  ;;  %s4553_s29 = smov 80  }
 0x73a   : > { %v1228_v14 = vpop.xlane.xlu0 %1227 }
 0x73b   : > { %3778 = vrcp.f32 %v1228_v14 }
 0x73e   : > { %v1384_v17 = vpop.permute.xlu0 %1383 }
 0x748   : > { %v3779_v15 = vpop.eup %3778 }
 0x749   : > { %v1230_v16 = vmul.f32 %v3779_v15, %v3777_v12 }
 0x74b   : > { %3550 = vmatmul.mubr.msk.f32.vlgmr.msra.gmra.mxu1 %vm666_vm2, %v1230_v16 }
 0x74c   : > { %3558 = vmatpush3.xpose.msk.msra.mxu1 %vm666_vm2, %v1384_v17  ;;  %3559 = vmatprep.mubr.msk.f32.mxu1 %vm3875_vm1, %v3874_v8 }
 0x74d   : > { %3567 = vmatprep.subr.mxu1 %v3874_v8 }
 0x74f   : > { %3560 = vmatmul.mubr.msk.f32.vlgmr.msra.gmra.mxu1 %vm666_vm2, %v1382_v18 }
 0x750   : > { %3569 = vmatprep.mubr.msk.f32.mxu1 %vm3875_vm1, %v3874_v8  ;;  %3568 = vmatpush3.msra.mxu1 %v662_v33  ;;  %v3354_v33 = vld [vmem:[%s4545_s3 + $0x38] sm:$0xff] }
 0x751   : > { %3583 = vmatprep.subr.mxu1 %v3874_v8 }
 0x80b   : > { %v1303_v21 = vpop.f32.mrf.mxu1 }
 0x80c   : > { %3555 = vmatmul.mubr.msk.f32.vlgmr.msra.gmra.mxu0 %vm666_vm2, %v1303_v21  ;;  %v3347_v21 = vld [vmem:[%s4517_s12] ss:$0 sm:$0xff] }
 0x80d   : > { %v3551_v22 = vpop.f32.mrf.mxu1  ;;  %3564 = vmatprep.mubr.msk.f32.mxu0 %vm3875_vm1, %v3874_v8 }
 0x80f   : > { %v1455_v24 = vpop.f32.mrf.mxu1 }
 0x810   : > { %v1459_v25 = vmul.f32 0.35355338, %v1455_v24 }
 0x811   : > { %v3561_v26 = vpop.f32.mrf.mxu1 }
 0x812   : > { %v1460_v27 = vsel %vm666_vm2, %v1459_v25, -inf }
 0x813   : > { %1461 = vmax.xlane.f32.xlu1 %v1460_v27 }
 0x89c   : > { %v1462_v28 = vpop.xlane.xlu1 %1461 }
 0x89d   : > { %v1463_v29 = vsub.f32 %v1459_v25, %v1462_v28 }
 0x89f   : > { %v1464_v30 = vmul.f32 1.442695, %v1463_v29 }
 0x8a1   : > { %3780 = vpow2.f32 %v1464_v30 }
 0x8ae   : > { %v3781_v31 = vpop.eup %3780 }
 0x8af   : > { %v1466_v32 = vsel %vm666_vm2, %v3781_v31, 0.0 }
 0x8b0   : > { %1467 = vadd.xlane.f32.xlu0 %v1466_v32 }
 0x8c6   : > { %1471 = vrot.lane.b32.xlu0 %v4070_v23, %s4529_s22  ;;  %s4554_s22 = smov 64  }
 0x8cc   : > { %v1376_v34 = vpop.f32.mrf.mxu0 }
 0x8cd   : > { %v1380_v35 = vadd.f32 %v1376_v34, %v1138_v1  ;;  %v3353_v34 = vld [vmem:[%s4545_s3 + $0x30] sm:$0xff] }
 0x8ce   : > { %v3556_v36 = vpop.f32.mrf.mxu0 }
 0x8cf   : > { %v3351_v36 = vld [vmem:[%s4545_s3 + $0x20] sm:$0xff] }
 0x939   : > { %v1468_v37 = vpop.xlane.xlu0 %1467 }
 0x93a   : > { %3782 = vrcp.f32 %v1468_v37 }
 0x93d   : > { %v1472_v38 = vpop.permute.xlu0 %1471 }
 0x93e   : > { %3563 = vmatpush3.msra.mxu0 %v1472_v38 }
 0x93f   : > { %3572 = vmatprep.subr.mxu0 %v3874_v8 }
 0x947   : > { %v3783_v39 = vpop.eup %3782 }
 0x948   : > { %v1470_v40 = vmul.f32 %v3783_v39, %v3781_v31 }
 0x94a   : > { %3565 = vmatmul.mubr.msk.f32.vlgmr.msra.gmra.mxu0 %vm666_vm2, %v1470_v40 }
 0x94b   : > { %3580 = vmatprep.mubr.msk.f32.mxu0 %vm3875_vm1, %v3874_v8  ;;  %3573 = vmatpush3.msra.mxu0 %v1662_v54 }
 0x94c   : > { %3574 = vmatprep.subr.mxu0 %v3874_v8 }
 0x94d   : > { %3575 = vmatpush3.msra.mxu0 %v1661_v55 }
 0x94e   : > { %3576 = vmatprep.subr.mxu0 %v3874_v8 }
 0xa0a   : > { %v1543_v23 = vpop.f32.mrf.mxu0 }
 0xa0b   : > { %3570 = vmatmul.mubr.msk.f32.vlgmr.msra.gmra.mxu1 %vm666_vm2, %v1543_v23  ;;  %v3349_v23 = vld [vmem:[%s4518_s13] ss:$0 sm:$0xff] }
 0xa0c   : > { %v3566_v41 = vpop.f32.mrf.mxu0  ;;  %3599 = vmatprep.mubr.msk.f32.mxu1 %vm3875_vm1, %v3874_v8  ;;  %3584 = vmatpush3.msra.mxu1 %v1755_v2 }
 0xa0d   : > { %3585 = vmatprep.subr.mxu1 %v3874_v8 }
 0xa0e   : > { %3586 = vmatpush3.msra.mxu1 %v1754_v3 }
 0xa0f   : > { %3587 = vmatprep.subr.mxu1 %v3874_v8 }
 0xa10   : > { %3588 = vmatpush3.msra.mxu1 %v1753_v4 }
 0xa11   : > { %3589 = vmatprep.subr.mxu1 %v3874_v8 }
 0xa12   : > { %3590 = vmatpush3.msra.mxu1 %v1752_v5 }
 0xa13   : > { %3591 = vmatprep.subr.mxu1 %v3874_v8 }
 0xa14   : > { %3592 = vmatpush3.msra.mxu1 %v1751_v6 }
 0xa15   : > { %3593 = vmatprep.subr.mxu1 %v3874_v8 }
 0xa16   : > { %3594 = vmatpush3.msra.mxu1 %v1750_v7 }
 0xa17   : > { %3595 = vmatprep.subr.mxu1 %v3874_v8 }
 0xa18   : > { %3596 = vmatpush3.msra.mxu1 %v1749_v9 }
 0xa19   : > { %3597 = vmatprep.subr.mxu1 %v3874_v8 }
 0xa1a   : > { %3598 = vmatpush3.msra.mxu1 %v1748_v10 }
 0xa1b   : > { %3618 = vmatprep.subr.mxu1 %v3874_v8 }
 0xacb   : > { %v1616_v42 = vpop.f32.mrf.mxu1 }
 0xacc   : > { %v1620_v44 = vadd.f32 %v1616_v42, %v1380_v35  ;;  %v3352_v35 = vld [vmem:[%s4545_s3 + $0x28] sm:$0xff]  ;;  %v3350_v42 = vld [vmem:[%s4519_s14] ss:$0 sm:$0xff] }
 0xacd   : > { %v3571_v45 = vpop.f32.mrf.mxu1 }
 0xace   : > { %v1628_v46 = vadd.f32 %v3342_v43, %v1620_v44  ;;  %v3356_v45 = vld [vmem:[%s4548_s4 + $0x1] ss:$0 sm:$0xff] }
 0xad0   : > { %v1629_v47 = vadd.f32 %v1628_v46, %v4061_v20  ;;  %v1660_v20 = vld [vmem:[%s4514_s9 + $0x8] sm:$0xff] }
 0xad1   : > { %3577 = vmatpush3.msra.mxu0 %v1660_v20 }
 0xad2   : > { %v1632_v48 = vsel %vm546_vm0, %v1629_v47, 0.0  ;;  %3578 = vmatprep.subr.mxu0 %v3874_v8 }
 0xad3   : > { %1633 = vadd.xlane.f32.xlu1 %v1632_v48  ;;  %3579 = vmatpush3.msra.mxu0 %v1659_v56 }
 0xad4   : > { %3602 = vmatprep.subr.mxu0 %v3874_v8 }
 0xb5c   : > { %v1634_v49 = vpop.xlane.xlu1 %1633 }
 0xb5d   : > { %v1635_v50 = vmul.f32 0.03125, %v1634_v49 }
 0xb5f   : > { %v1636_v51 = vsub.f32 %v1629_v47, %v1635_v50 }
 0xb61   : > { %v1637_v52 = vmul.f32 %v1636_v51, %v1636_v51 }
 0xb63   : > { %v1638_v53 = vsel %vm546_vm0, %v1637_v52, 0.0 }
 0xb64   : > { %1639 = vadd.xlane.f32.xlu1 %v1638_v53 }
 0xbed   : > { %v1640_v57 = vpop.xlane.xlu1 %1639 }
 0xbee   : > { %v1641_v58 = vmul.f32 0.03125, %v1640_v57 }
 0xbf0   : > { %v1642_v59 = vadd.f32 1e-12, %v1641_v58 }
 0xbf2   : > { %3784 = vrsqrt.f32 %v1642_v59 }
 0xbff   : > { %v3785_v60 = vpop.eup %3784 }
 0xc00   : > { %v1644_v62 = vmul.f32 %v3785_v60, %v1636_v51 }
 0xc02   : > { %v1651_v0 = vmul.f32 %v3343_v61, %v1644_v62 }
 0xc04   : > { %v1658_v1 = vadd.f32 %v3344_v63, %v1651_v0 }
 0xc06   : > { %3581 = vmatmul.mubr.msk.f32.vlgmr.msra.gmra.mxu0 %vm546_vm0, %v1658_v1 }
 0xc07   : > { %3610 = vmatprep.mubr.msk.f32.mxu0 %vm3875_vm1, %v3874_v8  ;;  %3603 = vmatpush3.msra.mxu0 %v3354_v33 }
 0xc08   : > { %3604 = vmatprep.subr.mxu0 %v3874_v8 }
 0xc09   : > { %3605 = vmatpush3.msra.mxu0 %v3353_v34 }
 0xc0a   : > { %3606 = vmatprep.subr.mxu0 %v3874_v8 }
 0xc0b   : > { %3607 = vmatpush3.msra.mxu0 %v3352_v35 }
 0xc0c   : > { %3608 = vmatprep.subr.mxu0 %v3874_v8 }
 0xc0d   : > { %3609 = vmatpush3.msra.mxu0 %v3351_v36 }
 0xc0e   : > { %3613 = vmatprep.subr.mxu0 %v3874_v8 }
 0xcc6   : > { %v1739_v12 = vpop.f32.mrf.mxu0 }
 0xcc7   : > { %v1740_v13 = vadd.f32 %v3345_v11, %v1739_v12 }
 0xcc8   : > { %v3582_v14 = vpop.f32.mrf.mxu0 }
 0xcc9   : > { %v1744_v15 = vmul.f32 0.70710677, %v1740_v13  ;;  %v1743_v17 = vmul.f32 0.5, %v1740_v13  ;;  %v3358_v14 = vld [vmem:[%s4510_s5 + $0x20] sm:$0xff] }
 0xccb   : > { %3786 = verf.f32 %v1744_v15  ;;  %v3359_v15 = vld [vmem:[%s4510_s5 + $0x28] sm:$0xff] }
 0xcd8   : > { %v3787_v16 = vpop.eup %3786 }
 0xcd9   : > { %v1746_v18 = vadd.f32 1.0, %v3787_v16 }
 0xcdb   : > { %v1747_v19 = vmul.f32 %v1746_v18, %v1743_v17 }
 0xcdd   : > { %3600 = vmatmul.mubr.msk.f32.vlgmr.msra.gmra.mxu1 %vm1763_vm3, %v1747_v19 }
 0xcde   : > { %3620 = vmatprep.mubr.msk.f32.mxu1 %vm3875_vm1, %v3874_v8 }
 0xd9d   : > { %v1833_v22 = vpop.f32.mrf.mxu1 }
 0xd9e   : > { %v1834_v24 = vadd.f32 %v3347_v21, %v1833_v22 }
 0xd9f   : > { %v3601_v25 = vpop.f32.mrf.mxu1 }
 0xda0   : > { %v1837_v26 = vadd.f32 %v1834_v24, %v1658_v1 }
 0xda2   : > { %v1840_v27 = vsel %vm546_vm0, %v1837_v26, 0.0 }
 0xda3   : > { %1841 = vadd.xlane.f32.xlu1 %v1840_v27 }
 0xe2c   : > { %v1842_v28 = vpop.xlane.xlu1 %1841 }
 0xe2d   : > { %v1843_v29 = vmul.f32 0.03125, %v1842_v28 }
 0xe2f   : > { %v1844_v30 = vsub.f32 %v1837_v26, %v1843_v29 }
 0xe31   : > { %v1845_v31 = vmul.f32 %v1844_v30, %v1844_v30 }
 0xe33   : > { %v1846_v32 = vsel %vm546_vm0, %v1845_v31, 0.0 }
 0xe34   : > { %1847 = vadd.xlane.f32.xlu1 %v1846_v32 }
 0xebd   : > { %v1848_v37 = vpop.xlane.xlu1 %1847 }
 0xebe   : > { %v1849_v38 = vmul.f32 0.03125, %v1848_v37 }
 0xec0   : > { %v1850_v39 = vadd.f32 1e-12, %v1849_v38 }
 0xec2   : > { %3788 = vrsqrt.f32 %v1850_v39 }
 0xecf   : > { %v3789_v40 = vpop.eup %3788 }
 0xed0   : > { %v1852_v41 = vmul.f32 %v3789_v40, %v1844_v30 }
 0xed2   : > { %v1859_v43 = vmul.f32 %v3349_v23, %v1852_v41 }
 0xed4   : > { %v4263_v44 = vadd.f32 %v3350_v42, %v1859_v43  ;;  %v3360_v43 = vld [vmem:[%s4510_s5 + $0x30] sm:$0xff] }
 0xed6   : > { %3611 = vmatmul.mubr.msk.f32.vlgmr.msra.gmra.mxu0 %vm546_vm0, %v4263_v44 }
 0xed7   : > { %3615 = vmatprep.mubr.msk.f32.mxu0 %vm3875_vm1, %v3874_v8 }
 0xf96   : > { %v1949_v46 = vpop.f32.mrf.mxu0 }
 0xf97   : > { %v4272_v47 = vadd.f32 %v3356_v45, %v1949_v46 }
 0xf98   : > { %v3612_v48 = vpop.f32.mrf.mxu0 }
 0xf99   : > { %2125 = vrot.lane.b32.xlu0 %v4272_v47, %s4549_s23  ;;  %1959 = vrot.lane.b32.xlu1 %v4272_v47, %s4550_s26  ;;  %s4559_s23 = smov 40   ;;  %s537_s26 = sand.u32 1, %s3864_s25  }
 0xf9a   : > { %s538_s2 = scalar_lea.vmem [#allocation2], %s537_s26 }
 0xf9b   : > { %s3262_s3 = sshll.u32 %s538_s2, 4  ;;  %s3263_s3 = int_to_ptr.vmem [resolvable:$true] %s3262_s3 }
 0xf9c   : > { %s3812_s4 = scalar_lea.vmem %s3263_s3, 16 }
 0xf9d   : > { %2123 = vrot.lane.b32.xlu0 %v4272_v47, %s4551_s19  ;;  %p3813_p11 = scmp.ne.s32.totalorder %s3263_s3, %s3812_s4 }
 0xf9f   : > { %p3814_p12 = pnand %p3813_p11, %p4016_p5 }
 0xfa1   : > { %p3815_p13 = pneg %p3814_p12 }
0x100b   : > { %v1960_v49 = vpop.permute.xlu1 %1959  ;;  %v2126_v50 = vpop.permute.xlu0 %2125 }
0x100c   : > { %3614 = vmatpush3.xpose.msk.msra.mxu0 %vm666_vm2, %v1960_v49 }
0x100d   : > { %3623 = vmatprep.subr.mxu0 %v3874_v8 }
0x100f   : > { %3616 = vmatmul.mubr.msk.f32.vlgmr.msra.gmra.mxu0 %vm666_vm2, %v4272_v47  ;;  %v2124_v51 = vpop.permute.xlu0 %2123 }
0x1010   : > { %3624 = vmatpush3.xpose.msk.msra.mxu0 %vm666_vm2, %v2126_v50  ;;  %3625 = vmatprep.mubr.msk.f32.mxu0 %vm3875_vm1, %v3874_v8 }
0x1011   : > { %3633 = vmatprep.subr.mxu0 %v3874_v8 }
0x1013   : > { %3626 = vmatmul.mubr.msk.f32.vlgmr.msra.gmra.mxu0 %vm666_vm2, %v2124_v51 }
0x1014   : > { %3635 = vmatprep.mubr.msk.f32.mxu0 %vm3875_vm1, %v3874_v8  ;;  %3634 = vmatpush3.msra.mxu0 %v3359_v15  ;;  %v3386_v15 = vld [vmem:[%s4514_s9 + $0x30] sm:$0xff] }
0x1015   : > { %3643 = vmatprep.subr.mxu0 %v3874_v8 }
0x10cf   : > { %v2031_v52 = vpop.f32.mrf.mxu0 }
0x10d0   : > { %v2035_v53 = vmul.f32 0.35355338, %v2031_v52 }
0x10d1   : > { %v3617_v54 = vpop.f32.mrf.mxu0 }
0x10d2   : > { %v2036_v55 = vsel %vm666_vm2, %v2035_v53, -inf }
0x10d3   : > { %2037 = vmax.xlane.f32.xlu0 %v2036_v55  ;;  %v2197_v20 = vpop.f32.mrf.mxu0 }
0x10d4   : > { %v2201_v56 = vmul.f32 0.35355338, %v2197_v20 }
0x10d5   : > { %v3627_v57 = vpop.f32.mrf.mxu0 }
0x10d6   : > { %v2202_v58 = vsel %vm666_vm2, %v2201_v56, -inf  ;;  %v3361_v57 = vld [vmem:[%s4510_s5 + $0x38] sm:$0xff] }
0x10d7   : > { %2203 = vmax.xlane.f32.xlu1 %v2202_v58 }
0x10e8   : > { %2213 = vrot.lane.b32.xlu1 %v4272_v47, %s4552_s21  ;;  %s4556_s21 = smov 72  }
0x10ec   : > { %2437 = vrot.lane.b32.xlu1 %v4272_v47, %s4553_s29  ;;  %s4557_s29 = smov 104  }
0x115c   : > { %v2038_v59 = vpop.xlane.xlu0 %2037 }
0x115d   : > { %v2039_v60 = vsub.f32 %v2035_v53, %v2038_v59 }
0x115f   : > { %v2040_v61 = vmul.f32 1.442695, %v2039_v60 }
0x1160   : > { %v2204_v62 = vpop.xlane.xlu1 %2203 }
0x1161   : > { %3790 = vpow2.f32 %v2040_v61  ;;  %v2205_v63 = vsub.f32 %v2201_v56, %v2204_v62 }
0x1163   : > { %v2206_v0 = vmul.f32 1.442695, %v2205_v63 }
0x1164   : > { %v2214_v11 = vpop.permute.xlu1 %2213 }
0x1165   : > { %3792 = vpow2.f32 %v2206_v0 }
0x1168   : > { %v2438_v19 = vpop.permute.xlu1 %2437 }
0x116e   : > { %v3791_v1 = vpop.eup %3790 }
0x116f   : > { %v2042_v2 = vsel %vm666_vm2, %v3791_v1, 0.0 }
0x1170   : > { %2043 = vadd.xlane.f32.xlu0 %v2042_v2  ;;  %v3379_v2 = vld [vmem:[%s4511_s6 + $0x1] ss:$0 sm:$0xff] }
0x1172   : > { %v3793_v3 = vpop.eup %3792 }
0x1173   : > { %v2208_v4 = vsel %vm666_vm2, %v3793_v3, 0.0 }
0x1174   : > { %2209 = vadd.xlane.f32.xlu0 %v2208_v4 }
0x118a   : > { %2047 = vrot.lane.b32.xlu0 %v4272_v47, %s4554_s22  ;;  %s4558_s22 = smov 48  }
0x118e   : > { %2435 = vrot.lane.b32.xlu0 %v4272_v47, %s4555_s30 }
0x11f9   : > { %v2044_v5 = vpop.xlane.xlu0 %2043 }
0x11fa   : > { %3794 = vrcp.f32 %v2044_v5 }
0x11fd   : > { %v2210_v6 = vpop.xlane.xlu0 %2209 }
0x11fe   : > { %3796 = vrcp.f32 %v2210_v6 }
0x1201   : > { %v2048_v7 = vpop.permute.xlu0 %2047 }
0x1202   : > { %3619 = vmatpush3.msra.mxu1 %v2048_v7 }
0x1203   : > { %3628 = vmatprep.subr.mxu1 %v3874_v8 }
0x1205   : > { %v2436_v22 = vpop.permute.xlu0 %2435 }
0x1207   : > { %v3795_v9 = vpop.eup %3794 }
0x1208   : > { %v2046_v10 = vmul.f32 %v3795_v9, %v3791_v1 }
0x120a   : > { %3621 = vmatmul.mubr.msk.f32.vlgmr.msra.gmra.mxu1 %vm666_vm2, %v2046_v10 }
0x120b   : > { %v3797_v12 = vpop.eup %3796  ;;  %3629 = vmatpush3.msra.mxu1 %v2214_v11  ;;  %3630 = vmatprep.mubr.msk.f32.mxu1 %vm3875_vm1, %v3874_v8 }
0x120c   : > { %v2212_v13 = vmul.f32 %v3797_v12, %v3793_v3  ;;  %3638 = vmatprep.subr.mxu1 %v3874_v8 }
0x120e   : > { %3631 = vmatmul.mubr.msk.f32.vlgmr.msra.gmra.mxu1 %vm666_vm2, %v2212_v13 }
0x120f   : > { %3640 = vmatprep.mubr.msk.f32.mxu1 %vm3875_vm1, %v3874_v8  ;;  %3639 = vmatpush3.msra.mxu1 %v3358_v14  ;;  %v3387_v14 = vld [vmem:[%s4514_s9 + $0x38] sm:$0xff] }
0x1210   : > { %3648 = vmatprep.subr.mxu1 %v3874_v8 }
0x12ca   : > { %v2119_v16 = vpop.f32.mrf.mxu1 }
0x12cb   : > { %3641 = vmatmul.mubr.msk.f32.vlgmr.msra.gmra.mxu1 %vm666_vm2, %v2119_v16  ;;  %v3384_v16 = vld [vmem:[%s4514_s9 + $0x20] sm:$0xff] }
0x12cc   : > { %v3622_v17 = vpop.f32.mrf.mxu1  ;;  %3650 = vmatprep.mubr.msk.f32.mxu1 %vm3875_vm1, %v3874_v8 }
0x12ce   : > { %v2285_v18 = vpop.f32.mrf.mxu1 }
0x12cf   : > { %3636 = vmatmul.mubr.msk.f32.vlgmr.msra.gmra.mxu0 %vm666_vm2, %v2285_v18 }
0x12d0   : > { %3644 = vmatpush3.xpose.msk.msra.mxu0 %vm666_vm2, %v2438_v19  ;;  %v3632_v21 = vpop.f32.mrf.mxu1  ;;  %3645 = vmatprep.mubr.msk.f32.mxu0 %vm3875_vm1, %v3874_v8 }
0x12d1   : > { %3653 = vmatprep.subr.mxu0 %v3874_v8 }
0x12d3   : > { %3646 = vmatmul.mubr.msk.f32.vlgmr.msra.gmra.mxu0 %vm666_vm2, %v2436_v22  ;;  %v3382_v22 = vld [vmem:[%s4512_s7 + $0x1] ss:$0 sm:$0xff] }
0x12d4   : > { %3655 = vmatprep.mubr.msk.f32.mxu0 %vm3875_vm1, %v3874_v8  ;;  %3654 = vmatpush3.msra.mxu0 %v3360_v43 }
0x12d5   : > { %3663 = vmatprep.subr.mxu0 %v3874_v8 }
0x138b   : > { %v2431_v24 = vpop.f32.mrf.mxu1 }
0x138d   : > { %v3642_v25 = vpop.f32.mrf.mxu1 }
0x138e   : > { %v3383_v25 = vld [vmem:[%s4513_s8 + $0x1] ss:$0 sm:$0xff] }
0x138f   : > { %v2358_v26 = vpop.f32.mrf.mxu0 }
0x1390   : > { %v2432_v27 = vadd.f32 %v2431_v24, %v2358_v26 }
0x1391   : > { %v3637_v28 = vpop.f32.mrf.mxu0 }
0x1392   : > { %v3398_v28 = vld [vmem:[%s4516_s11 + $0x78] sm:$0xff] }
0x1393   : > { %v2509_v29 = vpop.f32.mrf.mxu0 }
0x1394   : > { %v2513_v30 = vmul.f32 0.35355338, %v2509_v29  ;;  %v3397_v29 = vld [vmem:[%s4516_s11 + $0x70] sm:$0xff] }
0x1395   : > { %v3647_v31 = vpop.f32.mrf.mxu0 }
0x1396   : > { %v2514_v32 = vsel %vm666_vm2, %v2513_v30, -inf  ;;  %v3395_v31 = vld [vmem:[%s4516_s11 + $0x60] sm:$0xff] }
0x1397   : > { %2515 = vmax.xlane.f32.xlu1 %v2514_v32  ;;  %v3394_v32 = vld [vmem:[%s4516_s11 + $0x58] sm:$0xff] }
0x13a8   : > { %2677 = vrot.lane.b32.xlu1 %v4272_v47, %s4556_s21 }
0x13ac   : > { %2675 = vrot.lane.b32.xlu1 %v4272_v47, %s4557_s29  ;;  %s3407_s29 = sshll.u32 %s3999_s28, 4  ;;  %s3887_s28 = smov [#allocation2]  }
0x13ad   : > { %s4470_s18 = scalar_lea.hbm %s4522_s17, %s3407_s29  ;;  %s3816_s19 = sshll.u32 %s3887_s28, 4  ;;  %s3817_s19 = int_to_ptr.vmem [resolvable:$false] %s3816_s19 }
0x13ae   : > { %s3818_s21 = scalar_lea.vmem %s3817_s19, 32  ;;  %p3819_p0 = scmp.lt.s32.totalorder %s3263_s3, %s3817_s19 }
0x13af   : > { %p3820_p1 = scmp.lt.s32.totalorder %s3818_s21, %s3812_s4 }
0x13b1   : > { %p3821_p2 = por %p3820_p1, %p3819_p0 }
0x13b3   : > { %p3822_p3 = pnand %p3821_p2, %p3815_p13 }
0x1420   : > { %v2516_v33 = vpop.xlane.xlu1 %2515 }
0x1421   : > { %v2517_v34 = vsub.f32 %v2513_v30, %v2516_v33  ;;  %v3396_v30 = vld [vmem:[%s4516_s11 + $0x68] sm:$0xff]  ;;  %v3393_v33 = vld [vmem:[%s4516_s11 + $0x50] sm:$0xff] }
0x1423   : > { %v2518_v35 = vmul.f32 1.442695, %v2517_v34  ;;  %v3392_v34 = vld [vmem:[%s4516_s11 + $0x48] sm:$0xff] }
0x1424   : > { %v2678_v23 = vpop.permute.xlu1 %2677 }
0x1425   : > { %3798 = vpow2.f32 %v2518_v35  ;;  %v3391_v35 = vld [vmem:[%s4516_s11 + $0x40] sm:$0xff] }
0x1428   : > { %v2676_v42 = vpop.permute.xlu1 %2675 }
0x1432   : > { %v3799_v36 = vpop.eup %3798 }
0x1433   : > { %v2520_v37 = vsel %vm666_vm2, %v3799_v36, 0.0 }
0x1434   : > { %2521 = vadd.xlane.f32.xlu0 %v2520_v37 }
0x144a   : > { %2525 = vrot.lane.b32.xlu0 %v4272_v47, %s4558_s22 }
0x14bd   : > { %v2522_v38 = vpop.xlane.xlu0 %2521 }
0x14be   : > { %3800 = vrcp.f32 %v2522_v38 }
0x14c1   : > { %v2526_v39 = vpop.permute.xlu0 %2525 }
0x14c2   : > { %3649 = vmatpush3.msra.mxu1 %v2526_v39 }
0x14c3   : > { %3658 = vmatprep.subr.mxu1 %v3874_v8 }
0x14cb   : > { %v3801_v40 = vpop.eup %3800 }
0x14cc   : > { %v2524_v41 = vmul.f32 %v3801_v40, %v3799_v36  ;;  %v3389_v36 = vld [vmem:[%s4515_s10 + $0x1] ss:$0 sm:$0xff] }
0x14ce   : > { %3651 = vmatmul.mubr.msk.f32.vlgmr.msra.gmra.mxu1 %vm666_vm2, %v2524_v41 }
0x14cf   : > { %3659 = vmatpush3.xpose.msk.msra.mxu1 %vm666_vm2, %v2678_v23  ;;  %3660 = vmatprep.mubr.msk.f32.mxu1 %vm3875_vm1, %v3874_v8 }
0x14d0   : > { %3668 = vmatprep.subr.mxu1 %v3874_v8 }
0x14d2   : > { %3661 = vmatmul.mubr.msk.f32.vlgmr.msra.gmra.mxu1 %vm666_vm2, %v2676_v42 }
0x14d3   : > { %3670 = vmatprep.mubr.msk.f32.mxu1 %vm3875_vm1, %v3874_v8  ;;  %3669 = vmatpush3.msra.mxu1 %v3361_v57  ;;  %v3171_v57 = vld [vmem:[%s4520_s15 + $0x10] sm:$0xff] }
0x14d4   : > { %3684 = vmatprep.subr.mxu1 %v3874_v8 }
0x158e   : > { %v2597_v45 = vpop.f32.mrf.mxu1 }
0x158f   : > { %3656 = vmatmul.mubr.msk.f32.vlgmr.msra.gmra.mxu0 %vm666_vm2, %v2597_v45  ;;  %v3400_v45 = vld [vmem:[%s4517_s12 + $0x1] ss:$0 sm:$0xff] }
0x1590   : > { %v3652_v46 = vpop.f32.mrf.mxu1  ;;  %3665 = vmatprep.mubr.msk.f32.mxu0 %vm3875_vm1, %v3874_v8 }
0x1592   : > { %v2749_v48 = vpop.f32.mrf.mxu1 }
0x1593   : > { %v2753_v49 = vmul.f32 0.35355338, %v2749_v48 }
0x1594   : > { %v3662_v50 = vpop.f32.mrf.mxu1 }
0x1595   : > { %v2754_v51 = vsel %vm666_vm2, %v2753_v49, -inf }
0x1596   : > { %2755 = vmax.xlane.f32.xlu0 %v2754_v51 }
0x15ac   : > { %2765 = vrot.lane.b32.xlu0 %v4272_v47, %s4559_s23  ;;  %s3250_s23 = scalar_lea.sflag [#allocation3], %s537_s26 }
0x161f   : > { %v2756_v52 = vpop.xlane.xlu0 %2755 }
0x1620   : > { %v2757_v53 = vsub.f32 %v2753_v49, %v2756_v52 }
0x1622   : > { %v2758_v54 = vmul.f32 1.442695, %v2757_v53 }
0x1623   : > { %v2766_v55 = vpop.permute.xlu0 %2765 }
0x1624   : > { %3802 = vpow2.f32 %v2758_v54  ;;  %3664 = vmatpush3.msra.mxu0 %v2766_v55 }
0x1625   : > { %3673 = vmatprep.subr.mxu0 %v3874_v8 }
0x1631   : > { %v3803_v20 = vpop.eup %3802 }
0x1632   : > { %v2760_v56 = vsel %vm666_vm2, %v3803_v20, 0.0 }
0x1633   : > { %2761 = vadd.xlane.f32.xlu1 %v2760_v56  ;;  %v3172_v56 = vld [vmem:[%s4520_s15 + $0x18] sm:$0xff] }
0x164f   : > { %v2670_v58 = vpop.f32.mrf.mxu0 }
0x1650   : > { %v2674_v47 = vadd.f32 %v2670_v58, %v2432_v27  ;;  %v3170_v58 = vld [vmem:[%s4520_s15 + $0x8] sm:$0xff] }
0x1651   : > { %v3657_v59 = vpop.f32.mrf.mxu0 }
0x16bc   : > { %v2762_v60 = vpop.xlane.xlu1 %2761 }
0x16bd   : > { %3804 = vrcp.f32 %v2762_v60 }
0x16ca   : > { %v3805_v61 = vpop.eup %3804 }
0x16cb   : > { %v2764_v62 = vmul.f32 %v3805_v61, %v3803_v20 }
0x16cd   : > { %3666 = vmatmul.mubr.msk.f32.vlgmr.msra.gmra.mxu0 %vm666_vm2, %v2764_v62 }
0x16ce   : > { %3681 = vmatprep.mubr.msk.f32.mxu0 %vm3875_vm1, %v3874_v8  ;;  %3674 = vmatpush3.msra.mxu0 %v3387_v14 }
0x16cf   : > { %3675 = vmatprep.subr.mxu0 %v3874_v8 }
0x16d0   : > { %3676 = vmatpush3.msra.mxu0 %v3386_v15 }
0x16d1   : > { %3677 = vmatprep.subr.mxu0 %v3874_v8 }
0x178d   : > { %v2837_v63 = vpop.f32.mrf.mxu0 }
0x178e   : > { %3671 = vmatmul.mubr.msk.f32.vlgmr.msra.gmra.mxu1 %vm666_vm2, %v2837_v63  ;;  %v3404_v63 = vld [vmem:[%s4518_s13 + $0x1] ss:$0 sm:$0xff] }
0x178f   : > { %v3667_v0 = vpop.f32.mrf.mxu0  ;;  %3700 = vmatprep.mubr.msk.f32.mxu1 %vm3875_vm1, %v3874_v8  ;;  %3685 = vmatpush3.msra.mxu1 %v3398_v28 }
0x1790   : > { %3686 = vmatprep.subr.mxu1 %v3874_v8 }
0x1791   : > { %3687 = vmatpush3.msra.mxu1 %v3397_v29 }
0x1792   : > { %3688 = vmatprep.subr.mxu1 %v3874_v8 }
0x1793   : > { %3689 = vmatpush3.msra.mxu1 %v3396_v30 }
0x1794   : > { %3690 = vmatprep.subr.mxu1 %v3874_v8 }
0x1795   : > { %3691 = vmatpush3.msra.mxu1 %v3395_v31 }
0x1796   : > { %3692 = vmatprep.subr.mxu1 %v3874_v8 }
0x1797   : > { %3693 = vmatpush3.msra.mxu1 %v3394_v32 }
0x1798   : > { %3694 = vmatprep.subr.mxu1 %v3874_v8 }
0x1799   : > { %3695 = vmatpush3.msra.mxu1 %v3393_v33 }
0x179a   : > { %3696 = vmatprep.subr.mxu1 %v3874_v8 }
0x179b   : > { %3697 = vmatpush3.msra.mxu1 %v3392_v34 }
0x179c   : > { %3698 = vmatprep.subr.mxu1 %v3874_v8 }
0x179d   : > { %3699 = vmatpush3.msra.mxu1 %v3391_v35 }
0x184e   : > { %v2910_v1 = vpop.f32.mrf.mxu1 }
0x184f   : > { %v2914_v3 = vadd.f32 %v2910_v1, %v2674_v47  ;;  %v3169_v47 = vld [vmem:[%s4520_s15] sm:$0xff] }
0x1850   : > { %v3672_v4 = vpop.f32.mrf.mxu1  ;;  %v3405_v1 = vld [vmem:[%s4519_s14 + $0x1] ss:$0 sm:$0xff] }
0x1851   : > { %v2923_v5 = vadd.f32 %v3379_v2, %v2914_v3 }
0x1853   : > { %v2924_v6 = vadd.f32 %v2923_v5, %v4263_v44  ;;  %v3385_v44 = vld [vmem:[%s4514_s9 + $0x28] sm:$0xff] }
0x1854   : > { %3678 = vmatpush3.msra.mxu0 %v3385_v44 }
0x1855   : > { %v2929_v7 = vsel %vm546_vm0, %v2924_v6, 0.0  ;;  %3679 = vmatprep.subr.mxu0 %v3874_v8 }
0x1856   : > { %2930 = vadd.xlane.f32.xlu1 %v2929_v7  ;;  %3680 = vmatpush3.msra.mxu0 %v3384_v16 }
0x1857   : > { %3703 = vmatprep.subr.mxu0 %v3874_v8 }
0x18df   : > { %v2931_v9 = vpop.xlane.xlu1 %2930 }
0x18e0   : > { %v2932_v10 = vmul.f32 0.03125, %v2931_v9 }
0x18e2   : > { %v2933_v11 = vsub.f32 %v2924_v6, %v2932_v10 }
0x18e4   : > { %v2934_v12 = vmul.f32 %v2933_v11, %v2933_v11 }
0x18e6   : > { %v2935_v13 = vsel %vm546_vm0, %v2934_v12, 0.0 }
0x18e7   : > { %2936 = vadd.xlane.f32.xlu1 %v2935_v13 }
0x1970   : > { %v2937_v17 = vpop.xlane.xlu1 %2936 }
0x1971   : > { %v2938_v18 = vmul.f32 0.03125, %v2937_v17 }
0x1973   : > { %v2939_v19 = vadd.f32 1e-12, %v2938_v18 }
0x1975   : > { %3806 = vrsqrt.f32 %v2939_v19 }
0x1982   : > { %v3807_v21 = vpop.eup %3806 }
0x1983   : > { %v2941_v24 = vmul.f32 %v3807_v21, %v2933_v11 }
0x1985   : > { %v2948_v26 = vmul.f32 %v3382_v22, %v2941_v24 }
0x1987   : > { %v2955_v27 = vadd.f32 %v3383_v25, %v2948_v26 }
0x1989   : > { %3682 = vmatmul.mubr.msk.f32.vlgmr.msra.gmra.mxu0 %vm546_vm0, %v2955_v27 }
0x198a   : > { %3711 = vmatprep.mubr.msk.f32.mxu0 %vm3875_vm1, %v3874_v8  ;;  %3704 = vmatpush3.msra.mxu0 %v3172_v56 }
0x198b   : > { %3705 = vmatprep.subr.mxu0 %v3874_v8 }
0x198c   : > { %3706 = vmatpush3.msra.mxu0 %v3171_v57 }
0x198d   : > { %3707 = vmatprep.subr.mxu0 %v3874_v8 }
0x198e   : > { %3708 = vmatpush3.msra.mxu0 %v3170_v58 }
0x198f   : > { %3709 = vmatprep.subr.mxu0 %v3874_v8  ;;  %v3173_v8 = vld [vmem:[%s4521_s16] sm:$0x1] }
0x1990   : > { %3710 = vmatpush3.msra.mxu0 %v3169_v47 }
0x1a49   : > { %v3038_v37 = vpop.f32.mrf.mxu0 }
0x1a4a   : > { %v3039_v38 = vadd.f32 %v3389_v36, %v3038_v37 }
0x1a4b   : > { %v3683_v39 = vpop.f32.mrf.mxu0 }
0x1a4c   : > { %v3043_v40 = vmul.f32 0.70710677, %v3039_v38  ;;  %v3042_v41 = vmul.f32 0.5, %v3039_v38 }
0x1a4e   : > { %3808 = verf.f32 %v3043_v40 }
0x1a5b   : > { %v3809_v23 = vpop.eup %3808 }
0x1a5c   : > { %v3045_v42 = vadd.f32 1.0, %v3809_v23 }
0x1a5e   : > { %v3046_v43 = vmul.f32 %v3045_v42, %v3042_v41 }
0x1a60   : > { %3701 = vmatmul.mubr.msk.f32.vlgmr.msra.gmra.mxu1 %vm1763_vm3, %v3046_v43 }
0x1b20   : > { %v3133_v46 = vpop.f32.mrf.mxu1 }
0x1b21   : > { %v3134_v48 = vadd.f32 %v3400_v45, %v3133_v46 }
0x1b22   : > { %v3702_v49 = vpop.f32.mrf.mxu1 }
0x1b23   : > { %v3137_v50 = vadd.f32 %v3134_v48, %v2955_v27 }
0x1b25   : > { %v3142_v51 = vsel %vm546_vm0, %v3137_v50, 0.0 }
0x1b26   : > { %3143 = vadd.xlane.f32.xlu1 %v3142_v51 }
0x1baf   : > { %v3144_v52 = vpop.xlane.xlu1 %3143 }
0x1bb0   : > { %v3145_v53 = vmul.f32 0.03125, %v3144_v52 }
0x1bb2   : > { %v3146_v54 = vsub.f32 %v3137_v50, %v3145_v53 }
0x1bb4   : > { %v3147_v55 = vmul.f32 %v3146_v54, %v3146_v54 }
0x1bb6   : > { %v3148_v20 = vsel %vm546_vm0, %v3147_v55, 0.0 }
0x1bb7   : > { %3149 = vadd.xlane.f32.xlu1 %v3148_v20 }
0x1c40   : > { %v3150_v59 = vpop.xlane.xlu1 %3149 }
0x1c41   : > { %v3151_v60 = vmul.f32 0.03125, %v3150_v59 }
0x1c43   : > { %v3152_v61 = vadd.f32 1e-12, %v3151_v60 }
0x1c45   : > { %3810 = vrsqrt.f32 %v3152_v61 }
0x1c52   : > { %v3811_v62 = vpop.eup %3810 }
0x1c53   : > { %v3154_v0 = vmul.f32 %v3811_v62, %v3146_v54 }
0x1c55   : > { %v3161_v2 = vmul.f32 %v3404_v63, %v3154_v0 }
0x1c57   : > { %v3168_v3 = vadd.f32 %v3405_v1, %v3161_v2 }
0x1c59   : > { %3712 = vmatmul.mubr.msk.f32.vlgmr.msra.gmra.mxu0 %vm546_vm0, %v3168_v3 }
0x1d19   : > { %v3243_v4 = vpop.f32.mrf.mxu0 }
0x1d1a   : > { %v3244_v5 = vadd.f32 %v3243_v4, %v3173_v8 }
0x1d1b   : > { %v3713_v6 = vpop.f32.mrf.mxu0 }
0x1d1c   : > { %3248 = vst.msk [vmem:[%s538_s2] sm:$0x1] %vm3247_vm4, %v3244_v5 }
0x1d1d   : > { %3825 = shalt.err (!%p3822_p3)
}
0x1d1e   : > { %s3826_s2 = scalar_lea.hbm %s4470_s18, 16  ;;  %s3830_s22 = scalar_lea.hbm %s4522_s17, 32 }
0x1d1f   : > { %p3827_p4 = scmp.ne.s32.totalorder %s4470_s18, %s3826_s2  ;;  %p3831_p9 = scmp.lt.s32.totalorder %s4470_s18, %s4522_s17 }
0x1d20   : > { %p3832_p10 = scmp.lt.s32.totalorder %s3830_s22, %s3826_s2 }
0x1d21   : > { %p3828_p7 = pnand %p3827_p4, %p4016_p5 }
0x1d22   : > { %p3833_p11 = por %p3832_p10, %p3831_p9 }
0x1d23   : > { %p3829_p8 = pneg %p3828_p7 }
0x1d25   : > { %p3834_p12 = pnand %p3833_p11, %p3829_p8 }
0x1d27   : > { %3837 = shalt.err (!%p3834_p12)
}
0x1d28   : > { %3714 = dma.vmem_to_hbm [thread:$0]  (%p4016_p5), %s3263_s3, 16, %s4470_s18, %s3250_s23  }
0x1d29 PF: > { %p3720_p13 = scmp.ge.s32.totalorder %s3872_s27, 2  ;;  %s3274_s4 = sand.u32 1, %s3860_s24  }
0x1d2a   : > { %s3275_s19 = scalar_lea.sflag [#allocation3], %s3274_s4 }
0x1d2b   : > { %p3717_p0 = pnand %p3720_p13, %p4020_p6 }
0x1d2d   : > { %p3718_p1 = pneg %p3717_p0 }
0x1d2f   : > { %3855 = dma.done.wait (%p3718_p1), %s3275_s19, 16  }
0x1d30   : > { %3857 = vsyncadd (%p3718_p1), %s3275_s19, 4294967280  ;;  %s4560_s21 = sld [smem:[#allocation5_spill]]  ;;  %p27_p2 = scmp.ge.s32.totalorder %s4003_s0, 4  }
0x1d31   : > { %s4561_s26 = sld [smem:[#allocation6_spill]]  ;;  %s4562_s24 = smov %s3864_s25 }
0x1d32   : > { %s4564_s27 = smov %s4003_s0  ;;  %29 = sbr.rel (!%p27_p2) target bundleno = 9 (0x9), region = 135 }
0x1d36   : > { %s4563_s25 = smov %s4560_s21 }
0x1d37   :  { %3279 = vsyncpa [#allocation3], 1 }
0x1d38   :  { %3281 = vsyncpa [#allocation3 + $0x1], 1 }

</bundles_post_ra>
